<compile_context>
chip_gen: v7x
topology: tpu7x:2x2x1
jax: 0.10.0
libtpu: 0.0.40
codegen_flags: <defaults>
</compile_context>

<pallas_src>
import numpy as np
import jax
import jax.numpy as jnp
from jax.experimental import pallas as pl
from jax.experimental.pallas import tpu as pltpu


# ----------------------- host-side constant builders ------------------------

def _col1(w):
    """Lane offset of conv1 output column (w, c=0) in the even/odd split 512-lane layout."""
    return (0 if w % 2 == 0 else 256) + (w // 2) * 16


def _col2(w):
    """Lane offset of conv2 output column (w, c=0) in the even/odd split 448-lane layout."""
    return (0 if w % 2 == 0 else 256) + (w // 2) * 32


def _prepare_constants(params, bn):
    """Build banded conv weights / bias rows / pooling row-compaction matrices once
    on the host (numpy).  Matmul operands are bf16 (exact for the 0/1 matrices),
    biases stay f32."""
    w1 = np.asarray(params['conv1_w'], np.float32)   # (3,3,3,16)  HWIO
    w2 = np.asarray(params['conv2_w'], np.float32)   # (3,3,16,32) HWIO
    b1 = np.asarray(params['conv1_b'], np.float32)   # (16,)
    b2 = np.asarray(params['conv2_b'], np.float32)   # (32,)

    # conv1: K = 3 shifts x 128 lanes (input padded 96->128), N = 512 lanes
    # (even-w outputs at [0,240), odd-w at [256,496), rest zero).
    w1full = np.zeros((3 * 128, 512), np.float32)
    b1full = np.zeros((1, 512), np.float32)
    for wo in range(30):
        b1full[0, _col1(wo):_col1(wo) + 16] = b1
        for kh in range(3):
            for kw in range(3):
                wi = wo + kw
                w1full[kh * 128 + wi * 3: kh * 128 + wi * 3 + 3,
                       _col1(wo):_col1(wo) + 16] = w1[kh, kw]          # (cin=3, cout=16)

    # conv2: input lanes are the pooled layout (w*16+c, padded to 256 per shift),
    # K = 3 shifts x 256, N = 448 (even-w at [0,224), odd-w at [256,448)).
    w2full = np.zeros((3 * 256, 448), np.float32)
    b2full = np.zeros((1, 448), np.float32)
    for wo in range(13):
        b2full[0, _col2(wo):_col2(wo) + 32] = b2
        for kh in range(3):
            for kw in range(3):
                wi = wo + kw
                w2full[kh * 256 + wi * 16: kh * 256 + wi * 16 + 16,
                       _col2(wo):_col2(wo) + 32] = w2[kh, kw]          # (cin=16, cout=32)

    # 0/1 row-compaction matrices: pick rowmax row b*Hin + 2*hp (simultaneously drops
    # the cross-image garbage rows created by stacking the batch along rows).
    s1 = np.zeros((bn * 15, bn * 32 - 3), np.float32)
    for b in range(bn):
        for hp in range(15):
            s1[b * 15 + hp, b * 32 + 2 * hp] = 1.0
    s2 = np.zeros((bn * 6, bn * 15 - 3), np.float32)
    for b in range(bn):
        for hp in range(6):
            s2[b * 6 + hp, b * 15 + 2 * hp] = 1.0

    bf = jnp.bfloat16
    return (jnp.asarray(w1full, bf), jnp.asarray(b1full, jnp.float32),
            jnp.asarray(s1, bf),
            jnp.asarray(w2full, bf), jnp.asarray(b2full, jnp.float32),
            jnp.asarray(s2, bf))


# ------------------------------- fused kernel -------------------------------

def _make_kernel(bn):
    r1 = bn * 32 - 2    # conv1 output rows inside a tile (incl. cross-image garbage rows)
    r2 = bn * 15 - 2    # conv2 output rows
    f32, bf16 = jnp.float32, jnp.bfloat16

    def kernel(x_ref, w1_ref, b1_ref, s1_ref, w2_ref, b2_ref, s2_ref, out_ref):
        x = x_ref[...]                                                      # (bn*32, 128) bf16

        # conv1 + bias + ReLU: one MXU matmul on the lane-concatenated row shifts.
        xcat = jnp.concatenate([x[0:r1], x[1:r1 + 1], x[2:r1 + 2]], axis=1)   # (r1, 384)
        c1 = jnp.dot(xcat, w1_ref[...], preferred_element_type=f32)           # (r1, 512)
        c1 = jnp.maximum(c1 + b1_ref[...], 0.0).astype(bf16)

        # maxpool1 2x2: row pairs on the VPU + ONE 0/1 compaction matmul;
        # lane pairs via the even/odd half-split layout (no matmul).
        rm1 = jnp.maximum(c1[0:r1 - 1], c1[1:r1])                              # (r1-1, 512)
        pr1 = jnp.dot(s1_ref[...], rm1, preferred_element_type=f32).astype(bf16)  # (bn*15, 512)
        p1 = jnp.maximum(pr1[:, 0:256], pr1[:, 256:512])                       # (bn*15, 256)

        # conv2 + bias + ReLU.
        pcat = jnp.concatenate([p1[0:r2], p1[1:r2 + 1], p1[2:r2 + 2]], axis=1)  # (r2, 768)
        c2 = jnp.dot(pcat, w2_ref[...], preferred_element_type=f32)             # (r2, 448)
        c2 = jnp.maximum(c2 + b2_ref[...], 0.0).astype(bf16)

        # maxpool2 2x2.
        rm2 = jnp.maximum(c2[0:r2 - 1], c2[1:r2])                               # (r2-1, 448)
        pr2 = jnp.dot(s2_ref[...], rm2, preferred_element_type=f32)             # (bn*6, 448)
        out_ref[...] = jnp.maximum(pr2[:, 0:192], pr2[:, 256:448])              # (bn*6, 192)

    return kernel


# --------------------------------- wrapper ----------------------------------

def _pick_block_n(n):
    # Largest batch tile <= 8 dividing n.  For n >= 16 this still leaves >= 2 grid
    # steps so dimension_semantics=("parallel",) can split across v7x's two TCs.
    for bn in (8, 4, 2, 1):
        if n % bn == 0:
            return bn
    return 1


def make_simple_cnn_forward(params, batch_size, block_n=None):
    """Returns a jitted forward for a fixed batch size.  All banded / selection
    constants are built once here (host-side numpy) and captured by the closure."""
    bn = _pick_block_n(batch_size) if block_n is None else block_n
    assert batch_size % bn == 0
    g = batch_size // bn

    consts = _prepare_constants(params, bn)
    fc1_w = jnp.asarray(params['fc1_w'], jnp.float32)
    fc1_b = jnp.asarray(params['fc1_b'], jnp.float32)
    fc2_w = jnp.asarray(params['fc2_w'], jnp.float32)
    fc2_b = jnp.asarray(params['fc2_b'], jnp.float32)
    fc3_w = jnp.asarray(params['fc3_w'], jnp.float32)
    fc3_b = jnp.asarray(params['fc3_b'], jnp.float32)

    in_specs = [pl.BlockSpec((bn * 32, 128), lambda t: (t, 0))]
    in_specs += [pl.BlockSpec(c.shape, lambda t: (0, 0)) for c in consts]

    conv_trunk = pl.pallas_call(
        _make_kernel(bn),
        out_shape=jax.ShapeDtypeStruct((g, bn * 6, 192), jnp.float32),
        grid=(g,),
        in_specs=in_specs,
        out_specs=pl.BlockSpec((None, bn * 6, 192), lambda t: (t, 0, 0)),
        compiler_params=pltpu.CompilerParams(
            dimension_semantics=("parallel",),
            vmem_limit_bytes=32 * 1024 * 1024),
    )

    @jax.jit
    def forward(x_nchw):
        assert x_nchw.shape == (batch_size, 3, 32, 32)
        n = batch_size
        # NCHW -> stacked lane-dense rows: row = img*32 + h, lane = w*3 + c,
        # padded to 128 lanes so the in-kernel shift-concat stays vreg-aligned.
        x2d = jnp.transpose(x_nchw, (0, 2, 3, 1)).reshape(n * 32, 96)
        x2d = jnp.pad(x2d, ((0, 0), (0, 32))).astype(jnp.bfloat16)
        p2 = conv_trunk(x2d, *consts)                         # (g, bn*6, 192) f32
        # flatten exactly like torch's x.view(-1, 32*6*6) on NCHW (c, h, w order)
        feat = p2.reshape(n, 6, 6, 32)                        # (img, h, w, c)
        flat = jnp.transpose(feat, (0, 3, 1, 2)).reshape(n, 32 * 6 * 6)
        hp = jax.lax.Precision.HIGHEST
        h1 = jax.nn.relu(jnp.dot(flat, fc1_w, precision=hp) + fc1_b)
        h2 = jax.nn.relu(jnp.dot(h1, fc2_w, precision=hp) + fc2_b)
        return jnp.dot(h2, fc3_w, precision=hp) + fc3_b

    return forward


# --------------------------- parameter init (torch-like) --------------------

def init_params(key):
    ks = jax.random.split(key, 10)

    def u(k, shape, fan_in):
        bound = float(fan_in) ** -0.5
        return jax.random.uniform(k, shape, jnp.float32, -bound, bound)

    return {
        'conv1_w': u(ks[0], (3, 3, 3, 16), 3 * 3 * 3),       # HWIO
        'conv1_b': u(ks[1], (16,), 3 * 3 * 3),
        'conv2_w': u(ks[2], (3, 3, 16, 32), 3 * 3 * 16),     # HWIO
        'conv2_b': u(ks[3], (32,), 3 * 3 * 16),
        'fc1_w':   u(ks[4], (32 * 6 * 6, 120), 32 * 6 * 6),
        'fc1_b':   u(ks[5], (120,), 32 * 6 * 6),
        'fc2_w':   u(ks[6], (120, 84), 120),
        'fc2_b':   u(ks[7], (84,), 120),
        'fc3_w':   u(ks[8], (84, 10), 84),
        'fc3_b':   u(ks[9], (10,), 84),
    }


# --------------------------- pure-JAX reference ------------------------------

def _reference_forward(x, params):
    hp = jax.lax.Precision.HIGHEST
    dn = ('NCHW', 'HWIO', 'NCHW')
    y = jax.lax.conv_general_dilated(x, params['conv1_w'], (1, 1), 'VALID',
                                     dimension_numbers=dn, precision=hp)
    y = jax.nn.relu(y + params['conv1_b'][None, :, None, None])
    y = jax.lax.reduce_window(y, -jnp.inf, jax.lax.max, (1, 1, 2, 2), (1, 1, 2, 2), 'VALID')
    y = jax.lax.conv_general_dilated(y, params['conv2_w'], (1, 1), 'VALID',
                                     dimension_numbers=dn, precision=hp)
    y = jax.nn.relu(y + params['conv2_b'][None, :, None, None])
    y = jax.lax.reduce_window(y, -jnp.inf, jax.lax.max, (1, 1, 2, 2), (1, 1, 2, 2), 'VALID')
    y = y.reshape(y.shape[0], 32 * 6 * 6)
    y = jax.nn.relu(jnp.dot(y, params['fc1_w'], precision=hp) + params['fc1_b'])
    y = jax.nn.relu(jnp.dot(y, params['fc2_w'], precision=hp) + params['fc2_b'])
    return jnp.dot(y, params['fc3_w'], precision=hp) + params['fc3_b']


if __name__ == "__main__":
    key = jax.random.PRNGKey(0)
    pkey, xkey, xkey2 = jax.random.split(key, 3)
    params = init_params(pkey)

    # Primary check: batch=2 (bn=2, single grid step).
    x = jax.random.normal(xkey, (2, 3, 32, 32), jnp.float32)
    fwd = make_simple_cnn_forward(params, batch_size=2)
    out = jax.block_until_ready(fwd(x))
    assert out.shape == (2, 10) and out.dtype == jnp.float32
    ref = jax.block_until_ready(_reference_forward(x, params))
    assert jnp.allclose(out, ref, rtol=2e-2, atol=2e-2), float(jnp.max(jnp.abs(out - ref)))

    # Multi-tile check: batch=4 with bn=2 -> grid of 2 (exercises batch tiling and
    # the cross-image garbage-row handling across grid steps).
    x4 = jax.random.normal(xkey2, (4, 3, 32, 32), jnp.float32)
    fwd4 = make_simple_cnn_forward(params, batch_size=4, block_n=2)
    out4 = jax.block_until_ready(fwd4(x4))
    ref4 = jax.block_until_ready(_reference_forward(x4, params))
    assert jnp.allclose(out4, ref4, rtol=2e-2, atol=2e-2), float(jnp.max(jnp.abs(out4 - ref4)))

    print("KERNEL_OK")
</pallas_src>

<mosaic_0001>
module attributes {stable_mosaic.version = 11 : i64} {
  func.func @kernel(%arg0: i32, %arg1: memref<64x128xbf16, #tpu.memory_space<vmem>>, %arg2: memref<384x512xbf16, #tpu.memory_space<vmem>>, %arg3: memref<1x512xf32, #tpu.memory_space<vmem>>, %arg4: memref<30x61xbf16, #tpu.memory_space<vmem>>, %arg5: memref<768x448xbf16, #tpu.memory_space<vmem>>, %arg6: memref<1x448xf32, #tpu.memory_space<vmem>>, %arg7: memref<12x27xbf16, #tpu.memory_space<vmem>>, %arg8: memref<1x12x192xf32, #tpu.memory_space<vmem>>) attributes {dimension_semantics = [#tpu.dimension_semantics<parallel>], iteration_bounds = array<i64: 1>, scalar_prefetch = 0 : i64, scratch_operands = 0 : i64, tpu.core_type = #tpu.core_type<tc>, window_params = [{transform_indices = @transform_0, window_bounds = array<i64: 64, 128>}, {pipeline_mode = #tpu.pipeline_mode<synchronous>, transform_indices = @transform_1, window_bounds = array<i64: 384, 512>}, {pipeline_mode = #tpu.pipeline_mode<synchronous>, transform_indices = @transform_2, window_bounds = array<i64: 1, 512>}, {pipeline_mode = #tpu.pipeline_mode<synchronous>, transform_indices = @transform_3, window_bounds = array<i64: 30, 61>}, {pipeline_mode = #tpu.pipeline_mode<synchronous>, transform_indices = @transform_4, window_bounds = array<i64: 768, 448>}, {pipeline_mode = #tpu.pipeline_mode<synchronous>, transform_indices = @transform_5, window_bounds = array<i64: 1, 448>}, {pipeline_mode = #tpu.pipeline_mode<synchronous>, transform_indices = @transform_6, window_bounds = array<i64: 12, 27>}, {transform_indices = @transform_7, window_bounds = array<i64: 1, 12, 192>}]} {
    %c0 = arith.constant 0 : index
    %c0_0 = arith.constant 0 : index
    %0 = vector.load %arg1[%c0, %c0_0] : memref<64x128xbf16, #tpu.memory_space<vmem>>, vector<64x128xbf16>
    %1 = vector.extract_strided_slice %0 {offsets = [0, 0], sizes = [62, 128], strides = [1, 1]} : vector<64x128xbf16> to vector<62x128xbf16>
    %2 = vector.extract_strided_slice %0 {offsets = [1, 0], sizes = [62, 128], strides = [1, 1]} : vector<64x128xbf16> to vector<62x128xbf16>
    %3 = vector.extract_strided_slice %0 {offsets = [2, 0], sizes = [62, 128], strides = [1, 1]} : vector<64x128xbf16> to vector<62x128xbf16>
    %4 = tpu.concatenate %1, %2, %3 in 1 : vector<62x128xbf16>, vector<62x128xbf16>, vector<62x128xbf16> -> vector<62x384xbf16>
    %c0_1 = arith.constant 0 : index
    %c0_2 = arith.constant 0 : index
    %5 = vector.load %arg2[%c0_1, %c0_2] : memref<384x512xbf16, #tpu.memory_space<vmem>>, vector<384x512xbf16>
    %cst = arith.constant dense<0.000000e+00> : vector<62x512xf32>
    %6 = tpu.matmul %4, %5, %cst {dimension_numbers = #tpu.dot_dimension_numbers<[1], [0], [0], [1], [0, 0, 1, 1], [], []>} : vector<62x384xbf16>, vector<384x512xbf16>, vector<62x512xf32> -> vector<62x512xf32>
    %c0_3 = arith.constant 0 : index
    %c0_4 = arith.constant 0 : index
    %7 = vector.load %arg3[%c0_3, %c0_4] : memref<1x512xf32, #tpu.memory_space<vmem>>, vector<1x512xf32>
    %8 = vector.broadcast %7 : vector<1x512xf32> to vector<62x512xf32>
    %9 = arith.addf %6, %8 : vector<62x512xf32>
    %cst_5 = arith.constant 0.000000e+00 : f32
    %10 = vector.broadcast %cst_5 : f32 to vector<62x512xf32>
    %11 = arith.maximumf %9, %10 : vector<62x512xf32>
    %12 = arith.truncf %11 : vector<62x512xf32> to vector<62x512xbf16>
    %13 = vector.extract_strided_slice %12 {offsets = [0, 0], sizes = [61, 512], strides = [1, 1]} : vector<62x512xbf16> to vector<61x512xbf16>
    %14 = vector.extract_strided_slice %12 {offsets = [1, 0], sizes = [61, 512], strides = [1, 1]} : vector<62x512xbf16> to vector<61x512xbf16>
    %15 = arith.maximumf %13, %14 : vector<61x512xbf16>
    %c0_6 = arith.constant 0 : index
    %c0_7 = arith.constant 0 : index
    %16 = vector.load %arg4[%c0_6, %c0_7] : memref<30x61xbf16, #tpu.memory_space<vmem>>, vector<30x61xbf16>
    %cst_8 = arith.constant dense<0.000000e+00> : vector<30x512xf32>
    %17 = tpu.matmul %16, %15, %cst_8 {dimension_numbers = #tpu.dot_dimension_numbers<[1], [0], [0], [1], [0, 0, 1, 1], [], []>} : vector<30x61xbf16>, vector<61x512xbf16>, vector<30x512xf32> -> vector<30x512xf32>
    %18 = arith.truncf %17 : vector<30x512xf32> to vector<30x512xbf16>
    %19 = vector.extract_strided_slice %18 {offsets = [0, 0], sizes = [30, 256], strides = [1, 1]} : vector<30x512xbf16> to vector<30x256xbf16>
    %20 = vector.extract_strided_slice %18 {offsets = [0, 256], sizes = [30, 256], strides = [1, 1]} : vector<30x512xbf16> to vector<30x256xbf16>
    %21 = arith.maximumf %19, %20 : vector<30x256xbf16>
    %22 = vector.extract_strided_slice %21 {offsets = [0, 0], sizes = [28, 256], strides = [1, 1]} : vector<30x256xbf16> to vector<28x256xbf16>
    %23 = vector.extract_strided_slice %21 {offsets = [1, 0], sizes = [28, 256], strides = [1, 1]} : vector<30x256xbf16> to vector<28x256xbf16>
    %24 = vector.extract_strided_slice %21 {offsets = [2, 0], sizes = [28, 256], strides = [1, 1]} : vector<30x256xbf16> to vector<28x256xbf16>
    %25 = tpu.concatenate %22, %23, %24 in 1 : vector<28x256xbf16>, vector<28x256xbf16>, vector<28x256xbf16> -> vector<28x768xbf16>
    %c0_9 = arith.constant 0 : index
    %c0_10 = arith.constant 0 : index
    %26 = vector.load %arg5[%c0_9, %c0_10] : memref<768x448xbf16, #tpu.memory_space<vmem>>, vector<768x448xbf16>
    %cst_11 = arith.constant dense<0.000000e+00> : vector<28x448xf32>
    %27 = tpu.matmul %25, %26, %cst_11 {dimension_numbers = #tpu.dot_dimension_numbers<[1], [0], [0], [1], [0, 0, 1, 1], [], []>} : vector<28x768xbf16>, vector<768x448xbf16>, vector<28x448xf32> -> vector<28x448xf32>
    %c0_12 = arith.constant 0 : index
    %c0_13 = arith.constant 0 : index
    %28 = vector.load %arg6[%c0_12, %c0_13] : memref<1x448xf32, #tpu.memory_space<vmem>>, vector<1x448xf32>
    %29 = vector.broadcast %28 : vector<1x448xf32> to vector<28x448xf32>
    %30 = arith.addf %27, %29 : vector<28x448xf32>
    %cst_14 = arith.constant 0.000000e+00 : f32
    %31 = vector.broadcast %cst_14 : f32 to vector<28x448xf32>
    %32 = arith.maximumf %30, %31 : vector<28x448xf32>
    %33 = arith.truncf %32 : vector<28x448xf32> to vector<28x448xbf16>
    %34 = vector.extract_strided_slice %33 {offsets = [0, 0], sizes = [27, 448], strides = [1, 1]} : vector<28x448xbf16> to vector<27x448xbf16>
    %35 = vector.extract_strided_slice %33 {offsets = [1, 0], sizes = [27, 448], strides = [1, 1]} : vector<28x448xbf16> to vector<27x448xbf16>
    %36 = arith.maximumf %34, %35 : vector<27x448xbf16>
    %c0_15 = arith.constant 0 : index
    %c0_16 = arith.constant 0 : index
    %37 = vector.load %arg7[%c0_15, %c0_16] : memref<12x27xbf16, #tpu.memory_space<vmem>>, vector<12x27xbf16>
    %cst_17 = arith.constant dense<0.000000e+00> : vector<12x448xf32>
    %38 = tpu.matmul %37, %36, %cst_17 {dimension_numbers = #tpu.dot_dimension_numbers<[1], [0], [0], [1], [0, 0, 1, 1], [], []>} : vector<12x27xbf16>, vector<27x448xbf16>, vector<12x448xf32> -> vector<12x448xf32>
    %39 = vector.extract_strided_slice %38 {offsets = [0, 0], sizes = [12, 192], strides = [1, 1]} : vector<12x448xf32> to vector<12x192xf32>
    %40 = vector.extract_strided_slice %38 {offsets = [0, 256], sizes = [12, 192], strides = [1, 1]} : vector<12x448xf32> to vector<12x192xf32>
    %41 = arith.maximumf %39, %40 : vector<12x192xf32>
    %c0_18 = arith.constant 0 : index
    %c0_19 = arith.constant 0 : index
    %c0_20 = arith.constant 0 : index
    %42 = vector.load %arg8[%c0_18, %c0_19, %c0_20] : memref<1x12x192xf32, #tpu.memory_space<vmem>>, vector<1x12x192xf32>
    %43 = vector.shape_cast %42 : vector<1x12x192xf32> to vector<12x192xf32>
    %44 = vector.shape_cast %41 : vector<12x192xf32> to vector<1x12x192xf32>
    tpu.vector_store %arg8[%c0_18, %c0_19, %c0_20], %44 {strides = array<i32>} : memref<1x12x192xf32, #tpu.memory_space<vmem>>, vector<1x12x192xf32>,
    return
  }
  func.func @transform_0(%arg0: i32) -> (i32, i32) {
    %c0_i32 = arith.constant 0 : i32
    %c0_i32_0 = arith.constant 0 : i32
    return %arg0, %c0_i32 : i32, i32
  }
  func.func @transform_1(%arg0: i32) -> (i32, i32) {
    %c0_i32 = arith.constant 0 : i32
    %c0_i32_0 = arith.constant 0 : i32
    %c0_i32_1 = arith.constant 0 : i32
    return %c0_i32, %c0_i32_0 : i32, i32
  }
  func.func @transform_2(%arg0: i32) -> (i32, i32) {
    %c0_i32 = arith.constant 0 : i32
    %c0_i32_0 = arith.constant 0 : i32
    %c0_i32_1 = arith.constant 0 : i32
    return %c0_i32, %c0_i32_0 : i32, i32
  }
  func.func @transform_3(%arg0: i32) -> (i32, i32) {
    %c0_i32 = arith.constant 0 : i32
    %c0_i32_0 = arith.constant 0 : i32
    %c0_i32_1 = arith.constant 0 : i32
    return %c0_i32, %c0_i32_0 : i32, i32
  }
  func.func @transform_4(%arg0: i32) -> (i32, i32) {
    %c0_i32 = arith.constant 0 : i32
    %c0_i32_0 = arith.constant 0 : i32
    %c0_i32_1 = arith.constant 0 : i32
    return %c0_i32, %c0_i32_0 : i32, i32
  }
  func.func @transform_5(%arg0: i32) -> (i32, i32) {
    %c0_i32 = arith.constant 0 : i32
    %c0_i32_0 = arith.constant 0 : i32
    %c0_i32_1 = arith.constant 0 : i32
    return %c0_i32, %c0_i32_0 : i32, i32
  }
  func.func @transform_6(%arg0: i32) -> (i32, i32) {
    %c0_i32 = arith.constant 0 : i32
    %c0_i32_0 = arith.constant 0 : i32
    %c0_i32_1 = arith.constant 0 : i32
    return %c0_i32, %c0_i32_0 : i32, i32
  }
  func.func @transform_7(%arg0: i32) -> (i32, i32, i32) {
    %c0_i32 = arith.constant 0 : i32
    %c0_i32_0 = arith.constant 0 : i32
    %c0_i32_1 = arith.constant 0 : i32
    return %arg0, %c0_i32, %c0_i32_0 : i32, i32, i32
  }
}

</mosaic_0001>

<bundles_post_ra>
// kernel: forward.1
= control target key start
LH: loop header
LB: loop body
LE: loop exit
PB: predicated region body
PF: predicated region fallthrough
CT: control target
= control target key end

     0   :  { %vm59_vm0 = vsmask.f32 7424  ;;  %vm95_vm1 = vcmask 1046528   ;;  %vm1222_vm2 = vcmask 1045504   ;;  %vm1215_vm3 = vcmask 498688   ;;  %s5210_s1 = inlined_call_operand.vmem [shape: bf16[384,512], index: 1, kind: input, shape index: {}]   ;;  %s5211_s0 = inlined_call_operand.vmem [shape: bf16[64,128], index: 0, kind: input, shape index: {}]   ;;  %s5212_s3 = inlined_call_operand.vmem [shape: bf16[30,61], index: 3, kind: input, shape index: {}]   ;;  %s5213_s4 = inlined_call_operand.vmem [shape: bf16[768,448], index: 4, kind: input, shape index: {}]   ;;  %s5214_s2 = inlined_call_operand.vmem [shape: f32[1,512], index: 2, kind: input, shape index: {}]   ;;  %s5215_s6 = inlined_call_operand.vmem [shape: bf16[12,27], index: 6, kind: input, shape index: {}]   ;;  %s5216_s5 = inlined_call_operand.vmem [shape: f32[1,448], index: 5, kind: input, shape index: {}]   ;;  %s5217_s7 = inlined_call_operand.vmem [shape: f32[1,12,192], index: 7, kind: output, shape index: {}]  }
   0x1   :  { %v3537_v0 = vld [vmem:[%s5210_s1 + $0x4] ss:$16 sps:$4 sm:$0xff]   ;;  %v3539_v1 = vld [vmem:[%s5210_s1 + $0xc] ss:$16 sps:$4 sm:$0xff]   ;;  %v3541_v2 = vld [vmem:[%s5210_s1] ss:$16 sps:$4 sm:$0xff]  }
   0x2   :  { %705 = vmatprep.subr.bf16.mxu0 %v3537_v0  ;;  %v3542_v3 = vld [vmem:[%s5210_s1 + $0x8] ss:$16 sps:$4 sm:$0xff]   ;;  %851 = vmatprep.subr.bf16.mxu1 %v3539_v1  ;;  %v3543_v4 = vld [vmem:[%s5210_s1 + $0x24] ss:$16 sps:$4 sm:$0xff]   ;;  %v3545_v5 = vld [vmem:[%s5210_s1 + $0x2c] ss:$16 sps:$4 sm:$0xff]  }
   0x3   :  { %706 = vmatpush1.bf16.msra.mxu0 %v3541_v2  ;;  %852 = vmatpush1.bf16.msra.mxu1 %v3542_v3  ;;  %v3547_v6 = vld [vmem:[%s5210_s1 + $0x20] ss:$16 sps:$4 sm:$0xff]   ;;  %v3548_v7 = vld [vmem:[%s5210_s1 + $0x28] ss:$16 sps:$4 sm:$0xff]   ;;  %v3549_v8 = vld [vmem:[%s5210_s1 + $0x44] ss:$16 sps:$4 sm:$0xff]  }
   0x4   :  { %707 = vmatprep.subr.bf16.mxu0 %v3543_v4  ;;  %853 = vmatprep.subr.bf16.mxu1 %v3545_v5  ;;  %v3551_v9 = vld [vmem:[%s5210_s1 + $0x4c] ss:$16 sps:$4 sm:$0xff]   ;;  %v3553_v10 = vld [vmem:[%s5210_s1 + $0x40] ss:$16 sps:$4 sm:$0xff]   ;;  %v3554_v11 = vld [vmem:[%s5210_s1 + $0x48] ss:$16 sps:$4 sm:$0xff]  }
   0x5   :  { %v3555_v12 = vld [vmem:[%s5210_s1 + $0x64] ss:$16 sps:$4 sm:$0xff]   ;;  %v3557_v13 = vld [vmem:[%s5210_s1 + $0x6c] ss:$16 sps:$4 sm:$0xff]   ;;  %v3559_v14 = vld [vmem:[%s5210_s1 + $0x60] ss:$16 sps:$4 sm:$0xff]  }
   0x6   :  { %v3560_v15 = vld [vmem:[%s5210_s1 + $0x68] ss:$16 sps:$4 sm:$0xff]   ;;  %v3561_v16 = vld [vmem:[%s5210_s1 + $0x84] ss:$16 sps:$4 sm:$0xff]   ;;  %v3563_v17 = vld [vmem:[%s5210_s1 + $0x8c] ss:$16 sps:$4 sm:$0xff]  }
   0x7   :  { %708 = vmatpush1.bf16.msra.mxu0 %v3547_v6  ;;  %854 = vmatpush1.bf16.msra.mxu1 %v3548_v7  ;;  %v3565_v18 = vld [vmem:[%s5210_s1 + $0x80] ss:$16 sps:$4 sm:$0xff]   ;;  %v3566_v19 = vld [vmem:[%s5210_s1 + $0x88] ss:$16 sps:$4 sm:$0xff]   ;;  %v3567_v20 = vld [vmem:[%s5210_s1 + $0xa4] ss:$16 sps:$4 sm:$0xff]  }
   0x8   :  { %709 = vmatprep.subr.bf16.mxu0 %v3549_v8  ;;  %855 = vmatprep.subr.bf16.mxu1 %v3551_v9  ;;  %v3569_v21 = vld [vmem:[%s5210_s1 + $0xac] ss:$16 sps:$4 sm:$0xff]   ;;  %v3571_v22 = vld [vmem:[%s5210_s1 + $0xa0] ss:$16 sps:$4 sm:$0xff]   ;;  %v3572_v23 = vld [vmem:[%s5210_s1 + $0xa8] ss:$16 sps:$4 sm:$0xff]  }
   0x9   :  { %v3573_v24 = vld [vmem:[%s5210_s1 + $0xc4] ss:$16 sps:$4 sm:$0xff]   ;;  %v3575_v25 = vld [vmem:[%s5210_s1 + $0xcc] ss:$16 sps:$4 sm:$0xff]   ;;  %v3577_v26 = vld [vmem:[%s5210_s1 + $0xc0] ss:$16 sps:$4 sm:$0xff]  }
   0xa   :  { %v3578_v27 = vld [vmem:[%s5210_s1 + $0xc8] ss:$16 sps:$4 sm:$0xff]   ;;  %v3579_v28 = vld [vmem:[%s5210_s1 + $0xe4] ss:$16 sps:$4 sm:$0xff]   ;;  %v3581_v29 = vld [vmem:[%s5210_s1 + $0xec] ss:$16 sps:$4 sm:$0xff]  }
   0xb   :  { %710 = vmatpush1.bf16.msra.mxu0 %v3553_v10  ;;  %856 = vmatpush1.bf16.msra.mxu1 %v3554_v11  ;;  %v3583_v30 = vld [vmem:[%s5210_s1 + $0xe0] ss:$16 sps:$4 sm:$0xff]   ;;  %v3584_v31 = vld [vmem:[%s5210_s1 + $0xe8] ss:$16 sps:$4 sm:$0xff]   ;;  %v3585_v32 = vld [vmem:[%s5210_s1 + $0x104] ss:$16 sps:$4 sm:$0xff]  }
   0xc   :  { %711 = vmatprep.subr.bf16.mxu0 %v3555_v12  ;;  %857 = vmatprep.subr.bf16.mxu1 %v3557_v13  ;;  %v3587_v33 = vld [vmem:[%s5210_s1 + $0x10c] ss:$16 sps:$4 sm:$0xff]   ;;  %v3589_v34 = vld [vmem:[%s5210_s1 + $0x100] ss:$16 sps:$4 sm:$0xff]   ;;  %v3590_v35 = vld [vmem:[%s5210_s1 + $0x108] ss:$16 sps:$4 sm:$0xff]  }
   0xd   :  { %v3591_v36 = vld [vmem:[%s5210_s1 + $0x124] ss:$16 sps:$4 sm:$0xff]   ;;  %v3593_v37 = vld [vmem:[%s5210_s1 + $0x12c] ss:$16 sps:$4 sm:$0xff]   ;;  %v3595_v38 = vld [vmem:[%s5210_s1 + $0x120] ss:$16 sps:$4 sm:$0xff]  }
   0xe   :  { %v3596_v39 = vld [vmem:[%s5210_s1 + $0x128] ss:$16 sps:$4 sm:$0xff]   ;;  %v3597_v40 = vld [vmem:[%s5210_s1 + $0x144] ss:$16 sps:$4 sm:$0xff]   ;;  %v3599_v41 = vld [vmem:[%s5210_s1 + $0x14c] ss:$16 sps:$4 sm:$0xff]  }
   0xf   :  { %712 = vmatpush1.bf16.msra.mxu0 %v3559_v14  ;;  %858 = vmatpush1.bf16.msra.mxu1 %v3560_v15  ;;  %v3601_v42 = vld [vmem:[%s5210_s1 + $0x140] ss:$16 sps:$4 sm:$0xff]   ;;  %v3602_v43 = vld [vmem:[%s5210_s1 + $0x148] ss:$16 sps:$4 sm:$0xff]   ;;  %v3603_v44 = vld [vmem:[%s5210_s1 + $0x164] ss:$16 sps:$4 sm:$0xff]  }
  0x10   :  { %713 = vmatprep.subr.bf16.mxu0 %v3561_v16  ;;  %859 = vmatprep.subr.bf16.mxu1 %v3563_v17  ;;  %v3605_v45 = vld [vmem:[%s5210_s1 + $0x16c] ss:$16 sps:$4 sm:$0xff]   ;;  %v3607_v46 = vld [vmem:[%s5210_s1 + $0x160] ss:$16 sps:$4 sm:$0xff]   ;;  %v3608_v47 = vld [vmem:[%s5210_s1 + $0x168] ss:$16 sps:$4 sm:$0xff]  }
  0x11   :  { %v4165_v48 = vld [vmem:[%s5211_s0] sm:$0xff]   ;;  %v4170_v49 = vld [vmem:[%s5211_s0 + $0x8] sm:$0xff]   ;;  %v4212_v4 = vld [vmem:[%s5211_s0 + $0x10] sm:$0xff]   ;;  %vm3007_vm4 = vcmask 1044480   ;;  %vm3003_vm5 = vcmask 220160   ;;  %vm3113_vm6 = vcmask 523264  }
  0x12   :  { %v3609_v50 = vld [vmem:[%s5210_s1 + $0x184] ss:$16 sps:$4 sm:$0xff]   ;;  %v3611_v51 = vld [vmem:[%s5210_s1 + $0x18c] ss:$16 sps:$4 sm:$0xff]   ;;  %v61_v52 = vshrl.u32 %v4165_v48, 16  ;;  %v63_v53 = vshll.u32 %v4165_v48, 16 }
  0x13   :  { %714 = vmatpush1.bf16.msra.mxu0 %v3565_v18  ;;  %860 = vmatpush1.bf16.msra.mxu1 %v3566_v19  ;;  %v68_v54 = vshll.u32 %v4170_v49, 16  ;;  %v3613_v55 = vld [vmem:[%s5210_s1 + $0x180] ss:$16 sps:$4 sm:$0xff]   ;;  %v3614_v56 = vld [vmem:[%s5210_s1 + $0x188] ss:$16 sps:$4 sm:$0xff]   ;;  %v72_v9 = vshrl.u32 %v4170_v49, 16 }
  0x14   :  { %715 = vmatprep.subr.bf16.mxu0 %v3567_v20  ;;  %861 = vmatprep.subr.bf16.mxu1 %v3569_v21  ;;  %v3615_v57 = vld [vmem:[%s5210_s1 + $0x1a4] ss:$16 sps:$4 sm:$0xff]   ;;  %v65_v58 = vrot.slane %v63_v53, 1  ;;  %v3617_v60 = vld [vmem:[%s5210_s1 + $0x1ac] ss:$16 sps:$4 sm:$0xff]   ;;  %v76_v10 = vshll.u32 %v4212_v4, 16 }
  0x15   :  { %v70_v59 = vrot.slane %v68_v54, 1  ;;  %v3619_v62 = vld [vmem:[%s5210_s1 + $0x1a0] ss:$16 sps:$4 sm:$0xff]   ;;  %v3620_v63 = vld [vmem:[%s5210_s1 + $0x1a8] ss:$16 sps:$4 sm:$0xff]   ;;  %vm3116_vm7 = vcmask 519168  }
  0x16   :  { %v66_v61 = vor.u32 %v65_v58, %v61_v52  ;;  %v3621_v1 = vld [vmem:[%s5210_s1 + $0x1c4] ss:$16 sps:$4 sm:$0xff]   ;;  %v3623_v2 = vld [vmem:[%s5210_s1 + $0x1cc] ss:$16 sps:$4 sm:$0xff]   ;;  %v3625_v3 = vld [vmem:[%s5210_s1 + $0x1c0] ss:$16 sps:$4 sm:$0xff]  }
  0x17   :  { %716 = vmatpush1.bf16.msra.mxu0 %v3571_v22  ;;  %862 = vmatpush1.bf16.msra.mxu1 %v3572_v23  ;;  %v3626_v5 = vld [vmem:[%s5210_s1 + $0x1c8] ss:$16 sps:$4 sm:$0xff]   ;;  %v3627_v6 = vld [vmem:[%s5210_s1 + $0x1e4] ss:$16 sps:$4 sm:$0xff]   ;;  %v3629_v7 = vld [vmem:[%s5210_s1 + $0x1ec] ss:$16 sps:$4 sm:$0xff]   ;;  %v74_v15 = vor.u32 %v72_v9, %v70_v59 }
  0x18   :  { %717 = vmatprep.subr.bf16.mxu0 %v3573_v24  ;;  %863 = vmatprep.subr.bf16.mxu1 %v3575_v25  ;;  %v71_v0 = vsel %vm59_vm0, %v66_v61, %v70_v59  ;;  %v3631_v8 = vld [vmem:[%s5210_s1 + $0x1e0] ss:$16 sps:$4 sm:$0xff]   ;;  %v3632_v11 = vld [vmem:[%s5210_s1 + $0x1e8] ss:$16 sps:$4 sm:$0xff]   ;;  %v3637_v12 = vld [vmem:[%s5210_s1 + $0x204] ss:$16 sps:$4 sm:$0xff]  }
  0x19   :  { %737 = vmatprep.mubr.bf16.mxu0 %v71_v0  ;;  %883 = vmatprep.mubr.bf16.mxu1 %v71_v0  ;;  %v3640_v13 = vld [vmem:[%s5210_s1 + $0x20c] ss:$16 sps:$4 sm:$0xff]   ;;  %v3635_v14 = vld [vmem:[%s5210_s1 + $0x200] ss:$16 sps:$4 sm:$0xff]   ;;  %v78_v16 = vrot.slane %v76_v10, 1  ;;  %v80_v22 = vshrl.u32 %v4212_v4, 16 }
  0x1a   :  { %v4243_v17 = vld [vmem:[%s5211_s0 + $0x18] sm:$0xff]   ;;  %v3643_v19 = vld [vmem:[%s5210_s1 + $0x224] ss:$16 sps:$4 sm:$0xff]   ;;  %v3641_v24 = vld [vmem:[%s5210_s1 + $0x220] ss:$16 sps:$4 sm:$0xff]   ;;  %v97_v58 = vrot.slane %v4170_v49, 1 }
  0x1b   :  { %718 = vmatpush1.bf16.msra.mxu0 %v3577_v26  ;;  %864 = vmatpush1.bf16.msra.mxu1 %v3578_v27  ;;  %v3638_v18 = vld [vmem:[%s5210_s1 + $0x208] ss:$16 sps:$4 sm:$0xff]   ;;  %v3646_v20 = vld [vmem:[%s5210_s1 + $0x22c] ss:$16 sps:$4 sm:$0xff]   ;;  %v79_v21 = vsel %vm59_vm0, %v74_v15, %v78_v16  ;;  %v84_v23 = vshll.u32 %v4243_v17, 16  ;;  %v3976_v59 = vmov 0  }
  0x1c   :  { %719 = vmatprep.subr.bf16.mxu0 %v3579_v28  ;;  %865 = vmatprep.subr.bf16.mxu1 %v3581_v29  ;;  %v3644_v25 = vld [vmem:[%s5210_s1 + $0x228] ss:$16 sps:$4 sm:$0xff]   ;;  %v3650_v26 = vld [vmem:[%s5210_s1 + $0x244] ss:$16 sps:$4 sm:$0xff]   ;;  %v3653_v27 = vld [vmem:[%s5210_s1 + $0x24c] ss:$16 sps:$4 sm:$0xff]   ;;  %v82_v28 = vor.u32 %v80_v22, %v78_v16 }
  0x1d   :  { %v86_v29 = vrot.slane %v84_v23, 1  ;;  %v3676_v52 = vld [vmem:[%s5210_s1 + $0x2c8] ss:$16 sps:$4 sm:$0xff]   ;;  %v3681_v53 = vld [vmem:[%s5210_s1 + $0x2e4] ss:$16 sps:$4 sm:$0xff]   ;;  %v101_v61 = vrot.slane %v4243_v17, 1 }
  0x1e   :  { %v3684_v54 = vld [vmem:[%s5210_s1 + $0x2ec] ss:$16 sps:$4 sm:$0xff]  }
  0x1f   :  { %720 = vmatpush1.bf16.msra.mxu0 %v3583_v30  ;;  %866 = vmatpush1.bf16.msra.mxu1 %v3584_v31  ;;  %v3648_v30 = vld [vmem:[%s5210_s1 + $0x240] ss:$16 sps:$4 sm:$0xff]   ;;  %v3651_v31 = vld [vmem:[%s5210_s1 + $0x248] ss:$16 sps:$4 sm:$0xff]  }
  0x20   :  { %721 = vmatprep.subr.bf16.mxu0 %v3585_v32  ;;  %867 = vmatprep.subr.bf16.mxu1 %v3587_v33  ;;  %v3656_v32 = vld [vmem:[%s5210_s1 + $0x264] ss:$16 sps:$4 sm:$0xff]   ;;  %v3659_v33 = vld [vmem:[%s5210_s1 + $0x26c] ss:$16 sps:$4 sm:$0xff]  }
  0x23   :  { %722 = vmatpush1.bf16.msra.mxu0 %v3589_v34  ;;  %868 = vmatpush1.bf16.msra.mxu1 %v3590_v35  ;;  %v87_v34 = vsel %vm59_vm0, %v82_v28, %v86_v29  ;;  %v3654_v35 = vld [vmem:[%s5210_s1 + $0x260] ss:$16 sps:$4 sm:$0xff]  }
  0x24   :  { %723 = vmatprep.subr.bf16.mxu0 %v3591_v36  ;;  %869 = vmatprep.subr.bf16.mxu1 %v3593_v37  ;;  %v3657_v36 = vld [vmem:[%s5210_s1 + $0x268] ss:$16 sps:$4 sm:$0xff]   ;;  %v3663_v37 = vld [vmem:[%s5210_s1 + $0x284] ss:$16 sps:$4 sm:$0xff]  }
  0x27   :  { %724 = vmatpush1.bf16.msra.mxu0 %v3595_v38  ;;  %870 = vmatpush1.bf16.msra.mxu1 %v3596_v39  ;;  %v3666_v38 = vld [vmem:[%s5210_s1 + $0x28c] ss:$16 sps:$4 sm:$0xff]   ;;  %v88_v39 = vshrl.u32 %v4243_v17, 16 }
  0x28   :  { %725 = vmatprep.subr.bf16.mxu0 %v3597_v40  ;;  %871 = vmatprep.subr.bf16.mxu1 %v3599_v41  ;;  %v3661_v40 = vld [vmem:[%s5210_s1 + $0x280] ss:$16 sps:$4 sm:$0xff]   ;;  %v3664_v41 = vld [vmem:[%s5210_s1 + $0x288] ss:$16 sps:$4 sm:$0xff]  }
  0x2b   :  { %726 = vmatpush1.bf16.msra.mxu0 %v3601_v42  ;;  %872 = vmatpush1.bf16.msra.mxu1 %v3602_v43  ;;  %v3669_v42 = vld [vmem:[%s5210_s1 + $0x2a4] ss:$16 sps:$4 sm:$0xff]   ;;  %v3672_v43 = vld [vmem:[%s5210_s1 + $0x2ac] ss:$16 sps:$4 sm:$0xff]  }
  0x2c   :  { %727 = vmatprep.subr.bf16.mxu0 %v3603_v44  ;;  %873 = vmatprep.subr.bf16.mxu1 %v3605_v45  ;;  %v90_v44 = vor.u32 %v88_v39, %v86_v29  ;;  %v3667_v45 = vld [vmem:[%s5210_s1 + $0x2a0] ss:$16 sps:$4 sm:$0xff]  }
  0x2f   :  { %728 = vmatpush1.bf16.msra.mxu0 %v3607_v46  ;;  %874 = vmatpush1.bf16.msra.mxu1 %v3608_v47  ;;  %v3670_v46 = vld [vmem:[%s5210_s1 + $0x2a8] ss:$16 sps:$4 sm:$0xff]   ;;  %v3675_v47 = vld [vmem:[%s5210_s1 + $0x2c4] ss:$16 sps:$4 sm:$0xff]  }
  0x30   :  { %729 = vmatprep.subr.bf16.mxu0 %v3609_v50  ;;  %875 = vmatprep.subr.bf16.mxu1 %v3611_v51  ;;  %v3678_v50 = vld [vmem:[%s5210_s1 + $0x2cc] ss:$16 sps:$4 sm:$0xff]   ;;  %v3673_v51 = vld [vmem:[%s5210_s1 + $0x2c0] ss:$16 sps:$4 sm:$0xff]  }
  0x33   :  { %730 = vmatpush1.bf16.msra.mxu0 %v3613_v55  ;;  %876 = vmatpush1.bf16.msra.mxu1 %v3614_v56  ;;  %v3679_v55 = vld [vmem:[%s5210_s1 + $0x2e0] ss:$16 sps:$4 sm:$0xff]   ;;  %v3682_v56 = vld [vmem:[%s5210_s1 + $0x2e8] ss:$16 sps:$4 sm:$0xff]  }
  0x34   :  { %731 = vmatprep.subr.bf16.mxu0 %v3615_v57  ;;  %877 = vmatprep.subr.bf16.mxu1 %v3617_v60  ;;  %v96_v57 = vrot.slane %v4165_v48, 1 }
  0x36   :  { %v98_v60 = vsel %vm95_vm1, %v96_v57, %v97_v58 }
  0x37   :  { %732 = vmatpush1.bf16.msra.mxu0 %v3619_v62  ;;  %878 = vmatpush1.bf16.msra.mxu1 %v3620_v63  ;;  %v205_v63 = vlaneseq }
  0x38   :  { %733 = vmatprep.subr.bf16.mxu0 %v3621_v1  ;;  %879 = vmatprep.subr.bf16.mxu1 %v3623_v2  ;;  %v203_v1 = vld [vmem:[%s5214_s2] sm:$0xf] }
  0x39   :  { %v4362_v0 = vshrl.u32 %v205_v63, 7 }
  0x3b   :  { %734 = vmatpush1.bf16.msra.mxu0 %v3625_v3  ;;  %880 = vmatpush1.bf16.msra.mxu1 %v3626_v5  ;;  %v207_v2 = vsub.s32 0, %v4362_v0  ;;  %v215_v3 = vsub.s32 2, %v4362_v0  ;;  %v219_v5 = vsub.s32 3, %v4362_v0 }
  0x3c   :  { %735 = vmatprep.subr.bf16.mxu0 %v3627_v6  ;;  %881 = vmatprep.subr.bf16.mxu1 %v3629_v7 }
  0x3d   :  { %v4373_v6 = vrot.slane %v203_v1, %v207_v2  ;;  %v4377_v7 = vrot.slane %v203_v1, %v215_v3  ;;  %v4385_v9 = vrot.slane %v203_v1, %v219_v5 }
  0x3f   :  { %736 = vmatpush1.bf16.msra.mxu0 %v3631_v8  ;;  %882 = vmatpush1.bf16.msra.mxu1 %v3632_v11 }
  0x40   :  { %778 = vmatprep.subr.bf16.mxu0 %v3637_v12  ;;  %924 = vmatprep.subr.bf16.mxu1 %v3640_v13 }
  0x42   :  { %738 = vmatmul.mubr.bf16.vlgmr.msra.gmra.mrb[0].mxu0 %v4165_v48  ;;  %884 = vmatmul.mubr.bf16.vlgmr.msra.gmra.mrb[0].mxu1 %v4165_v48  ;;  %v99_v48 = vrot.slane %v4212_v4, 1 }
  0x43   :  { %779 = vmatpush1.bf16.msra.mxu0 %v3635_v14  ;;  %925 = vmatpush1.bf16.msra.mxu1 %v3638_v18 }
  0x44   :  { %780 = vmatprep.subr.bf16.mxu0 %v3643_v19  ;;  %926 = vmatprep.subr.bf16.mxu1 %v3646_v20  ;;  %v102_v62 = vsel %vm95_vm1, %v99_v48, %v101_v61 }
  0x45   :  { %747 = vmatprep.mubr.bf16.mxu0 %v79_v21  ;;  %893 = vmatprep.mubr.bf16.mxu1 %v79_v21 }
  0x47   :  { %781 = vmatpush1.bf16.msra.mxu0 %v3641_v24  ;;  %927 = vmatpush1.bf16.msra.mxu1 %v3644_v25 }
  0x48   :  { %782 = vmatprep.subr.bf16.mxu0 %v3650_v26  ;;  %928 = vmatprep.subr.bf16.mxu1 %v3653_v27 }
  0x4a   :  { %748 = vmatmul.mubr.bf16.gmra.mrb[4].mxu0 %v4170_v49  ;;  %894 = vmatmul.mubr.bf16.gmra.mrb[4].mxu1 %v4170_v49  ;;  %v100_v49 = vsel %vm95_vm1, %v97_v58, %v99_v48 }
  0x4b   :  { %783 = vmatpush1.bf16.msra.mxu0 %v3648_v30  ;;  %929 = vmatpush1.bf16.msra.mxu1 %v3651_v31 }
  0x4c   :  { %784 = vmatprep.subr.bf16.mxu0 %v3656_v32  ;;  %930 = vmatprep.subr.bf16.mxu1 %v3659_v33 }
  0x4d   :  { %757 = vmatprep.mubr.bf16.mxu0 %v87_v34  ;;  %903 = vmatprep.mubr.bf16.mxu1 %v87_v34 }
  0x4f   :  { %785 = vmatpush1.bf16.msra.mxu0 %v3654_v35  ;;  %931 = vmatpush1.bf16.msra.mxu1 %v3657_v36 }
  0x50   :  { %786 = vmatprep.subr.bf16.mxu0 %v3663_v37  ;;  %932 = vmatprep.subr.bf16.mxu1 %v3666_v38 }
  0x52   :  { %758 = vmatmul.mubr.bf16.gmra.mrb[8].mxu0 %v4212_v4  ;;  %904 = vmatmul.mubr.bf16.gmra.mrb[8].mxu1 %v4212_v4  ;;  %v211_v4 = vsub.s32 1, %v4362_v0 }
  0x53   :  { %787 = vmatpush1.bf16.msra.mxu0 %v3661_v40  ;;  %933 = vmatpush1.bf16.msra.mxu1 %v3664_v41 }
  0x54   :  { %788 = vmatprep.subr.bf16.mxu0 %v3669_v42  ;;  %934 = vmatprep.subr.bf16.mxu1 %v3672_v43  ;;  %v4381_v8 = vrot.slane %v203_v1, %v211_v4 }
  0x55   :  { %767 = vmatprep.mubr.bf16.mxu0 %v90_v44  ;;  %913 = vmatprep.mubr.bf16.mxu1 %v90_v44 }
  0x57   :  { %789 = vmatpush1.bf16.msra.mxu0 %v3667_v45  ;;  %935 = vmatpush1.bf16.msra.mxu1 %v3670_v46 }
  0x58   :  { %790 = vmatprep.subr.bf16.mxu0 %v3675_v47  ;;  %936 = vmatprep.subr.bf16.mxu1 %v3678_v50 }
  0x5a   :  { %768 = vmatmul.mubr.bf16.gmra.mrb[12].mxu0 %v4243_v17  ;;  %914 = vmatmul.mubr.bf16.gmra.mrb[12].mxu1 %v4243_v17 }
  0x5b   :  { %791 = vmatpush1.bf16.msra.mxu0 %v3673_v51  ;;  %937 = vmatpush1.bf16.msra.mxu1 %v3676_v52  ;;  %v3977_v51 = vmov 65535  }
  0x5c   :  { %792 = vmatprep.subr.bf16.mxu0 %v3681_v53  ;;  %938 = vmatprep.subr.bf16.mxu1 %v3684_v54  ;;  %v4410_v52 = vsel %vm1222_vm2, 4294967295, %v3977_v51 }
  0x5d   :  { %810 = vmatprep.mubr.bf16.mxu0 %v3976_v59  ;;  %956 = vmatprep.mubr.bf16.mxu1 %v3976_v59 }
  0x5f   :  { %793 = vmatpush1.bf16.msra.mxu0 %v3679_v55  ;;  %939 = vmatpush1.bf16.msra.mxu1 %v3682_v56 }
  0x62   :  { %811 = vmatmul.mubr.bf16.vlgmr.msra.gmra.mrb[0].mxu0 %v98_v60  ;;  %957 = vmatmul.mubr.bf16.vlgmr.msra.gmra.mrb[0].mxu1 %v98_v60 }
  0x63   :  { %820 = vmatprep.mubr.bf16.mxu0 %v3976_v59  ;;  %966 = vmatprep.mubr.bf16.mxu1 %v3976_v59 }
  0x6a   :  { %821 = vmatmul.mubr.bf16.gmra.mrb[4].mxu0 %v100_v49  ;;  %967 = vmatmul.mubr.bf16.gmra.mrb[4].mxu1 %v100_v49 }
  0x6b   :  { %830 = vmatprep.mubr.bf16.mxu0 %v3976_v59  ;;  %976 = vmatprep.mubr.bf16.mxu1 %v3976_v59 }
  0x72   :  { %831 = vmatmul.mubr.bf16.gmra.mrb[8].mxu0 %v102_v62  ;;  %977 = vmatmul.mubr.bf16.gmra.mrb[8].mxu1 %v102_v62 }
  0x73   :  { %840 = vmatprep.mubr.bf16.mxu0 %v3976_v59  ;;  %986 = vmatprep.mubr.bf16.mxu1 %v3976_v59 }
  0x7a   :  { %841 = vmatmul.mubr.bf16.gmra.mrb[12].mxu0 %v101_v61  ;;  %987 = vmatmul.mubr.bf16.gmra.mrb[12].mxu1 %v101_v61 }
  0x7b   :  { %1270 = vmatprep.mubr.bf16.mxu0 %v3976_v59  ;;  %1323 = vmatprep.mubr.bf16.mxu1 %v3976_v59 }
 0x135   :  { %v812_v10 = vpop.f32.mrb[0].mxu0  ;;  %v958_v11 = vpop.f32.mrb[0].mxu1 }
 0x136   :  { %v3423_v12 = vadd.f32 %v812_v10, %v4373_v6  ;;  %v3439_v13 = vadd.f32 %v958_v11, %v4377_v7  ;;  %v814_v14 = vpop.f32.mrb[1].mxu0  ;;  %v960_v15 = vpop.f32.mrb[1].mxu1 }
 0x137   :  { %v3424_v16 = vadd.f32 %v814_v14, %v4381_v8  ;;  %v3440_v17 = vadd.f32 %v960_v15, %v4385_v9  ;;  %v816_v18 = vpop.f32.mrb[2].mxu0  ;;  %v962_v19 = vpop.f32.mrb[2].mxu1 }
 0x138   :  { %v3425_v20 = vadd.f32 %v816_v18, %v4373_v6  ;;  %v3441_v21 = vadd.f32 %v962_v19, %v4377_v7  ;;  %v818_v22 = vpop.f32.mrb[3].mxu0  ;;  %v964_v23 = vpop.f32.mrb[3].mxu1  ;;  %v997_v24 = vmax.f32 %v3423_v12, 0.0  ;;  %v999_v25 = vmax.f32 %v3439_v13, 0.0 }
 0x139   :  { %v3426_v26 = vadd.f32 %v818_v22, %v4381_v8  ;;  %v3442_v27 = vadd.f32 %v964_v23, %v4385_v9  ;;  %v998_v28 = vmax.f32 %v3424_v16, 0.0  ;;  %v1000_v31 = vmax.f32 %v3440_v17, 0.0 }
 0x13a   :  { %v1001_v29 = vmax.f32 %v3425_v20, 0.0  ;;  %v1003_v30 = vmax.f32 %v3441_v21, 0.0 }
 0x13b   :  { %v1002_v32 = vmax.f32 %v3426_v26, 0.0  ;;  %v1004_v33 = vmax.f32 %v3442_v27, 0.0 }
 0x13c   :  { %v4395_v34 = vpack.c.bf16 %v1001_v29, %v997_v24  ;;  %v4397_v35 = vpack.c.bf16 %v1003_v30, %v999_v25 }
 0x13d   :  { %v4399_v36 = vpack.c.bf16 %v1002_v32, %v998_v28  ;;  %v4401_v37 = vpack.c.bf16 %v1004_v33, %v1000_v31  ;;  %v822_v38 = vpop.f32.mrb[4].mxu0  ;;  %v968_v39 = vpop.f32.mrb[4].mxu1 }
 0x13e   :  { %v1048_v40 = vshll.u32 %v4395_v34, 16  ;;  %v1072_v41 = vshll.u32 %v4397_v35, 16  ;;  %v824_v42 = vpop.f32.mrb[5].mxu0  ;;  %v970_v43 = vpop.f32.mrb[5].mxu1  ;;  %v1046_v44 = vshrl.u32 %v4395_v34, 16  ;;  %v1070_v53 = vshrl.u32 %v4397_v35, 16 }
 0x13f   :  { %v1060_v45 = vshll.u32 %v4399_v36, 16  ;;  %v1084_v46 = vshll.u32 %v4401_v37, 16  ;;  %v826_v47 = vpop.f32.mrb[6].mxu0  ;;  %v972_v50 = vpop.f32.mrb[6].mxu1  ;;  %v1058_v54 = vshrl.u32 %v4399_v36, 16  ;;  %v3427_v55 = vadd.f32 %v822_v38, %v4373_v6 }
 0x140   :  { %v3443_v56 = vadd.f32 %v968_v39, %v4377_v7  ;;  %v828_v57 = vpop.f32.mrb[7].mxu0  ;;  %v974_v58 = vpop.f32.mrb[7].mxu1  ;;  %v1050_v60 = vrot.slane %v1048_v40, 1  ;;  %v1082_v48 = vshrl.u32 %v4401_v37, 16  ;;  %v3428_v49 = vadd.f32 %v824_v42, %v4381_v8 }
 0x141   :  { %v3444_v61 = vadd.f32 %v970_v43, %v4385_v9  ;;  %v1074_v62 = vrot.slane %v1072_v41, 1  ;;  %v1062_v63 = vrot.slane %v1060_v45, 1  ;;  %v1086_v1 = vrot.slane %v1084_v46, 1 }
 0x142   :  { %v1005_v10 = vmax.f32 %v3427_v55, 0.0  ;;  %v1007_v11 = vmax.f32 %v3443_v56, 0.0  ;;  %v3429_v12 = vadd.f32 %v826_v47, %v4373_v6  ;;  %v3445_v13 = vadd.f32 %v972_v50, %v4377_v7 }
 0x143   :  { %v1006_v14 = vmax.f32 %v3428_v49, 0.0  ;;  %v1008_v15 = vmax.f32 %v3444_v61, 0.0  ;;  %v3430_v16 = vadd.f32 %v828_v57, %v4381_v8  ;;  %v3446_v17 = vadd.f32 %v974_v58, %v4385_v9 }
 0x144   :  { %v1009_v18 = vmax.f32 %v3429_v12, 0.0  ;;  %v1011_v19 = vmax.f32 %v3445_v13, 0.0  ;;  %v4425_v28 = vor.u32 %v1050_v60, %v1046_v44  ;;  %v4427_v29 = vor.u32 %v1074_v62, %v1070_v53 }
 0x145   :  { %v832_v20 = vpop.f32.mrb[8].mxu0  ;;  %v978_v21 = vpop.f32.mrb[8].mxu1  ;;  %v1010_v22 = vmax.f32 %v3430_v16, 0.0  ;;  %v1012_v23 = vmax.f32 %v3446_v17, 0.0  ;;  %v1063_v43 = vor.u32 %v1062_v63, %v1058_v54 }
 0x146   :  { %v3431_v24 = vadd.f32 %v832_v20, %v4373_v6  ;;  %v3447_v25 = vadd.f32 %v978_v21, %v4377_v7  ;;  %v834_v26 = vpop.f32.mrb[9].mxu0  ;;  %v980_v27 = vpop.f32.mrb[9].mxu1  ;;  %v4429_v30 = vpack.c.bf16 %v1009_v18, %v1005_v10  ;;  %v4431_v31 = vpack.c.bf16 %v1011_v19, %v1007_v11 }
 0x147   :  { %v836_v32 = vpop.f32.mrb[10].mxu0  ;;  %v982_v33 = vpop.f32.mrb[10].mxu1  ;;  %v4433_v38 = vpack.c.bf16 %v1010_v22, %v1006_v14  ;;  %v4435_v39 = vpack.c.bf16 %v1012_v23, %v1008_v15  ;;  %v3432_v40 = vadd.f32 %v834_v26, %v4381_v8  ;;  %v3448_v47 = vadd.f32 %v980_v27, %v4385_v9 }
 0x148   :  { %v838_v41 = vpop.f32.mrb[11].mxu0  ;;  %v984_v42 = vpop.f32.mrb[11].mxu1  ;;  %v1053_v44 = vshll.u32 %v4429_v30, 16  ;;  %v1077_v45 = vshll.u32 %v4431_v31, 16  ;;  %v1013_v46 = vmax.f32 %v3431_v24, 0.0  ;;  %v1093_v50 = vshrl.u32 %v4429_v30, 16 }
 0x149   :  { %v1109_v53 = vshrl.u32 %v4431_v31, 16  ;;  %v1065_v55 = vshll.u32 %v4433_v38, 16  ;;  %v1015_v56 = vmax.f32 %v3447_v25, 0.0  ;;  %v1101_v58 = vshrl.u32 %v4433_v38, 16 }
 0x14a   :  { %v1055_v57 = vrot.slane %v1053_v44, 1  ;;  %v1089_v60 = vshll.u32 %v4435_v39, 16  ;;  %v1117_v54 = vshrl.u32 %v4435_v39, 16  ;;  %v1079_v49 = vrot.slane %v1077_v45, 1 }
 0x14b   :  { %v1014_v61 = vmax.f32 %v3432_v40, 0.0  ;;  %v3433_v62 = vadd.f32 %v836_v32, %v4373_v6  ;;  %v3449_v63 = vadd.f32 %v982_v33, %v4377_v7  ;;  %v1016_v10 = vmax.f32 %v3448_v47, 0.0 }
 0x14c   :  { %v3434_v11 = vadd.f32 %v838_v41, %v4381_v8  ;;  %v3450_v12 = vadd.f32 %v984_v42, %v4385_v9  ;;  %v1087_v15 = vor.u32 %v1086_v1, %v1082_v48  ;;  %v1067_v32 = vrot.slane %v1065_v55, 1 }
 0x14d   :  { %v842_v13 = vpop.f32.mrb[12].mxu0  ;;  %v988_v14 = vpop.f32.mrb[12].mxu1  ;;  %v1017_v16 = vmax.f32 %v3433_v62, 0.0  ;;  %v1019_v17 = vmax.f32 %v3449_v63, 0.0  ;;  %v1091_v33 = vrot.slane %v1089_v60, 1  ;;  %v1095_v42 = vor.u32 %v1093_v50, %v1055_v57 }
 0x14e   :  { %v3435_v18 = vadd.f32 %v842_v13, %v4373_v6  ;;  %v3451_v19 = vadd.f32 %v988_v14, %v4377_v7  ;;  %v844_v20 = vpop.f32.mrb[13].mxu0  ;;  %v990_v21 = vpop.f32.mrb[13].mxu1  ;;  %v1018_v22 = vmax.f32 %v3434_v11, 0.0  ;;  %v1020_v23 = vmax.f32 %v3450_v12, 0.0 }
 0x14f   :  { %v3436_v24 = vadd.f32 %v844_v20, %v4381_v8  ;;  %v4455_v25 = vadd.f32 %v990_v21, %v4385_v9  ;;  %v846_v26 = vpop.f32.mrb[14].mxu0  ;;  %v992_v27 = vpop.f32.mrb[14].mxu1  ;;  %v4457_v48 = vpack.c.bf16 %v1017_v16, %v1013_v46  ;;  %v4459_v1 = vpack.c.bf16 %v1019_v17, %v1015_v56 }
 0x150   :  { %v848_v40 = vpop.f32.mrb[15].mxu0  ;;  %v994_v41 = vpop.f32.mrb[15].mxu1  ;;  %v4461_v44 = vor.u32 %v1109_v53, %v1079_v49  ;;  %v4463_v45 = vpack.c.bf16 %v1018_v22, %v1014_v61  ;;  %v4465_v47 = vpack.c.bf16 %v1020_v23, %v1016_v10  ;;  %v1021_v63 = vmax.f32 %v3435_v18, 0.0 }
 0x151   :  { %v1097_v62 = vshll.u32 %v4457_v48, 16  ;;  %v1023_v11 = vmax.f32 %v3451_v19, 0.0  ;;  %v1022_v12 = vmax.f32 %v3436_v24, 0.0  ;;  %v1125_v55 = vshrl.u32 %v4457_v48, 16 }
 0x152   :  { %v1105_v46 = vshll.u32 %v4463_v45, 16  ;;  %v1121_v56 = vshll.u32 %v4465_v47, 16  ;;  %v1024_v60 = vmax.f32 %v4455_v25, 0.0  ;;  %v1113_v50 = vshll.u32 %v4459_v1, 16 }
 0x153   :  { %v1141_v53 = vshrl.u32 %v4459_v1, 16  ;;  %v1068_v61 = vsel %vm59_vm0, %v1063_v43, %v1067_v32  ;;  %v1092_v10 = vsel %vm59_vm0, %v1087_v15, %v1091_v33  ;;  %v1133_v13 = vshrl.u32 %v4463_v45, 16 }
 0x154   :  { %v1149_v14 = vshrl.u32 %v4465_v47, 16  ;;  %v1186_v16 = vmax.bf16 %v1068_v61, %v4399_v36  ;;  %v1188_v17 = vmax.bf16 %v1092_v10, %v4401_v37  ;;  %v1099_v18 = vrot.slane %v1097_v62, 1 }
 0x155   :  { %v1107_v19 = vrot.slane %v1105_v46, 1  ;;  %v3437_v20 = vadd.f32 %v846_v26, %v4373_v6  ;;  %v3453_v21 = vadd.f32 %v992_v27, %v4377_v7  ;;  %v1123_v22 = vrot.slane %v1121_v56, 1 }
 0x156   :  { %1238 = vmatprep.subr.bf16.mxu0 %v1186_v16  ;;  %1291 = vmatprep.subr.bf16.mxu1 %v1188_v17  ;;  %v1056_v43 = vsel %vm59_vm0, %v4425_v28, %v1055_v57  ;;  %v1080_v15 = vsel %vm59_vm0, %v4427_v29, %v1079_v49  ;;  %v3438_v23 = vadd.f32 %v848_v40, %v4381_v8  ;;  %v1115_v57 = vrot.slane %v1113_v50, 1 }
 0x157   :  { %v1025_v36 = vmax.f32 %v3437_v20, 0.0  ;;  %v1027_v24 = vmax.f32 %v3453_v21, 0.0  ;;  %v1185_v37 = vmax.bf16 %v1056_v43, %v4395_v34  ;;  %v1187_v25 = vmax.bf16 %v1080_v15, %v4397_v35 }
 0x158   :  { %v1026_v6 = vmax.f32 %v3438_v23, 0.0  ;;  %v3454_v7 = vadd.f32 %v994_v41, %v4385_v9  ;;  %v1103_v26 = vor.u32 %v1101_v58, %v1067_v32  ;;  %v1119_v28 = vor.u32 %v1117_v54, %v1091_v33 }
 0x159   :  { %v1041_v27 = vpack.c.bf16 %v1025_v36, %v1021_v63  ;;  %v1043_v29 = vpack.c.bf16 %v1027_v24, %v1023_v11  ;;  %1239 = vmatpush1.bf16.msra.mxu0 %v1185_v37  ;;  %1292 = vmatpush1.bf16.msra.mxu1 %v1187_v25  ;;  %v1100_v8 = vsel %vm59_vm0, %v1095_v42, %v1099_v18 }
 0x15a   :  { %v1042_v49 = vpack.c.bf16 %v1026_v6, %v1022_v12  ;;  %v1028_v34 = vmax.f32 %v3454_v7, 0.0  ;;  %v1108_v35 = vsel %vm59_vm0, %v1103_v26, %v1107_v19  ;;  %v1124_v40 = vsel %vm59_vm0, %v1119_v28, %v1123_v22  ;;  %v3685_v6 = vld [vmem:[%s5212_s3] sm:$0xff]   ;;  %v3690_v26 = vld [vmem:[%s5213_s4 + $0x8] ss:$16 sps:$4 sm:$0xff]  }
 0x15b   :  { %v1127_v9 = vor.u32 %v1125_v55, %v1099_v18  ;;  %v1129_v41 = vshll.u32 %v1041_v27, 16  ;;  %v1157_v62 = vshrl.u32 %v1041_v27, 16  ;;  %v1145_v58 = vshll.u32 %v1043_v29, 16  ;;  %v3687_v7 = vld [vmem:[%s5213_s4] ss:$16 sps:$4 sm:$0xff]  }
 0x15c   :  { %v1163_v32 = vshrl.u32 %v1043_v29, 16  ;;  %v1137_v46 = vshll.u32 %v1042_v49, 16  ;;  %v1044_v54 = vpack.c.bf16 %v1028_v34, %v1024_v60  ;;  %v1190_v33 = vmax.bf16 %v1108_v35, %v4433_v38  ;;  %v3695_v28 = vld [vmem:[%s5213_s4 + $0x24] ss:$16 sps:$4 sm:$0xff]   ;;  %v3686_v34 = vld [vmem:[%s5212_s3 + $0x8] sm:$0x7f]  }
 0x15d   :  { %v1131_v63 = vrot.slane %v1129_v41, 1  ;;  %v1147_v11 = vrot.slane %v1145_v58, 1  ;;  %v1192_v56 = vmax.bf16 %v1124_v40, %v4435_v39  ;;  %v1189_v42 = vmax.bf16 %v1100_v8, %v4429_v30  ;;  %v3701_v8 = vld [vmem:[%s5213_s4 + $0x44] ss:$16 sps:$4 sm:$0xff]   ;;  %v3699_v35 = vld [vmem:[%s5213_s4 + $0x40] ss:$16 sps:$4 sm:$0xff]  }
 0x15e   :  { %v1143_v12 = vor.u32 %v1141_v53, %v1115_v57  ;;  %v1139_v50 = vrot.slane %v1137_v46, 1  ;;  %v1153_v61 = vshll.u32 %v1044_v54, 16  ;;  %1240 = vmatprep.subr.bf16.mxu0 %v1190_v33  ;;  %v1116_v55 = vsel %vm59_vm0, %v4461_v44, %v1115_v57  ;;  %v3698_v57 = vld [vmem:[%s5213_s4 + $0x2c] ss:$16 sps:$4 sm:$0xff]   ;;  %v3702_v40 = vld [vmem:[%s5213_s4 + $0x48] ss:$16 sps:$4 sm:$0xff]  }
 0x15f   :  { %v1159_v10 = vor.u32 %v1157_v62, %v1131_v63  ;;  %v1165_v16 = vor.u32 %v1163_v32, %v1147_v11  ;;  %v1160_v17 = vshrl.u32 %v1042_v49, 16  ;;  %1293 = vmatprep.subr.bf16.mxu1 %v1192_v56  ;;  %1241 = vmatpush1.bf16.msra.mxu0 %v1189_v42  ;;  %v1191_v38 = vmax.bf16 %v1116_v55, %v4431_v31  ;;  %v3710_v41 = vld [vmem:[%s5213_s4 + $0x6c] ss:$16 sps:$4 sm:$0xff]   ;;  %v3705_v62 = vld [vmem:[%s5213_s4 + $0x60] ss:$16 sps:$4 sm:$0xff]  }
 0x160   :  { %v1155_v60 = vrot.slane %v1153_v61, 1  ;;  %v1135_v18 = vor.u32 %v1133_v13, %v1107_v19  ;;  %v1151_v20 = vor.u32 %v1149_v14, %v1123_v22  ;;  %v1132_v39 = vsel %vm59_vm0, %v1127_v9, %v1131_v63  ;;  %v3707_v9 = vld [vmem:[%s5213_s4 + $0x64] ss:$16 sps:$4 sm:$0xff]   ;;  %v3708_v58 = vld [vmem:[%s5213_s4 + $0x68] ss:$16 sps:$4 sm:$0xff]  }
 0x161   :  { %v1166_v30 = vshrl.u32 %v1044_v54, 16  ;;  %1294 = vmatpush1.bf16.msra.mxu1 %v1191_v38  ;;  %v1193_v53 = vmax.bf16 %v1132_v39, %v4457_v48  ;;  %v1148_v21 = vsel %vm59_vm0, %v1143_v12, %v1147_v11  ;;  %v1162_v23 = vor.u32 %v1160_v17, %v1139_v50  ;;  %v3713_v32 = vld [vmem:[%s5213_s4 + $0x84] ss:$16 sps:$4 sm:$0xff]   ;;  %v3716_v46 = vld [vmem:[%s5213_s4 + $0x8c] ss:$16 sps:$4 sm:$0xff]  }
 0x162   :  { %v1140_v44 = vsel %vm59_vm0, %v1135_v18, %v1139_v50  ;;  %v1156_v43 = vsel %vm59_vm0, %v1151_v20, %v1155_v60  ;;  %v1195_v15 = vmax.bf16 %v1148_v21, %v4459_v1  ;;  %v1225_v14 = vsel %vm95_vm1, %v4410_v52, 0  ;;  %v3689_v1 = vld [vmem:[%s5213_s4 + $0x4] ss:$16 sps:$4 sm:$0xff]   ;;  %v3714_v33 = vld [vmem:[%s5213_s4 + $0x88] ss:$16 sps:$4 sm:$0xff]  }
 0x163   :  { %v1194_v31 = vmax.bf16 %v1140_v44, %v4463_v45  ;;  %v1196_v13 = vmax.bf16 %v1156_v43, %v4465_v47  ;;  %v1168_v19 = vor.u32 %v1166_v30, %v1155_v60  ;;  %v1197_v22 = vmax.bf16 %v1159_v10, %v1041_v27  ;;  %v3692_v45 = vld [vmem:[%s5213_s4 + $0xc] ss:$16 sps:$4 sm:$0xff]   ;;  %v3693_v27 = vld [vmem:[%s5213_s4 + $0x20] ss:$16 sps:$4 sm:$0xff]   ;;  %v3719_v63 = vld [vmem:[%s5213_s4 + $0xa4] ss:$16 sps:$4 sm:$0xff]  }
 0x164   :  { %v1199_v36 = vmax.bf16 %v1165_v16, %v1043_v29  ;;  %v1198_v48 = vmax.bf16 %v1162_v23, %v1042_v49  ;;  %v3696_v29 = vld [vmem:[%s5213_s4 + $0x28] ss:$16 sps:$4 sm:$0xff]   ;;  %v3704_v49 = vld [vmem:[%s5213_s4 + $0x4c] ss:$16 sps:$4 sm:$0xff]   ;;  %v3717_v56 = vld [vmem:[%s5213_s4 + $0xa0] ss:$16 sps:$4 sm:$0xff]  }
 0x165   :  { %1242 = vmatprep.subr.bf16.mxu0 %v1194_v31  ;;  %1295 = vmatprep.subr.bf16.mxu1 %v1196_v13  ;;  %v1200_v24 = vmax.bf16 %v1168_v19, %v1044_v54  ;;  %v1227_v52 = vand.u32 %v1225_v14, %v1197_v22  ;;  %v3711_v54 = vld [vmem:[%s5213_s4 + $0x80] ss:$16 sps:$4 sm:$0xff]   ;;  %v3722_v11 = vld [vmem:[%s5213_s4 + $0xac] ss:$16 sps:$4 sm:$0xff]   ;;  %v3720_v42 = vld [vmem:[%s5213_s4 + $0xa8] ss:$16 sps:$4 sm:$0xff]  }
 0x166   :  { %1243 = vmatpush1.bf16.msra.mxu0 %v1193_v53  ;;  %1296 = vmatpush1.bf16.msra.mxu1 %v1195_v15  ;;  %v1230_v37 = vand.u32 %v1225_v14, %v1198_v48  ;;  %v1233_v47 = vand.u32 %v1225_v14, %v1199_v36  ;;  %v3725_v12 = vld [vmem:[%s5213_s4 + $0xc4] ss:$16 sps:$4 sm:$0xff]   ;;  %v3728_v50 = vld [vmem:[%s5213_s4 + $0xcc] ss:$16 sps:$4 sm:$0xff]   ;;  %v3723_v61 = vld [vmem:[%s5213_s4 + $0xc0] ss:$16 sps:$4 sm:$0xff]  }
 0x167   :  { %v1236_v25 = vand.u32 %v1225_v14, %v1200_v24  ;;  %v3726_v55 = vld [vmem:[%s5213_s4 + $0xc8] ss:$16 sps:$4 sm:$0xff]   ;;  %v3731_v10 = vld [vmem:[%s5213_s4 + $0xe4] ss:$16 sps:$4 sm:$0xff]   ;;  %v3734_v16 = vld [vmem:[%s5213_s4 + $0xec] ss:$16 sps:$4 sm:$0xff]  }
 0x168   :  { %1244 = vmatprep.subr.bf16.mxu0 %v1230_v37  ;;  %v3729_v17 = vld [vmem:[%s5213_s4 + $0xe0] ss:$16 sps:$4 sm:$0xff]   ;;  %v3732_v38 = vld [vmem:[%s5213_s4 + $0xe8] ss:$16 sps:$4 sm:$0xff]   ;;  %v3737_v60 = vld [vmem:[%s5213_s4 + $0x104] ss:$16 sps:$4 sm:$0xff]  }
 0x169   :  { %1297 = vmatprep.subr.bf16.mxu1 %v1236_v25  ;;  %v3740_v18 = vld [vmem:[%s5213_s4 + $0x10c] ss:$16 sps:$4 sm:$0xff]   ;;  %v3735_v20 = vld [vmem:[%s5213_s4 + $0x100] ss:$16 sps:$4 sm:$0xff]   ;;  %v3738_v39 = vld [vmem:[%s5213_s4 + $0x108] ss:$16 sps:$4 sm:$0xff]  }
 0x16a   :  { %1245 = vmatpush1.bf16.msra.mxu0 %v1227_v52  ;;  %1298 = vmatpush1.bf16.msra.mxu1 %v1233_v47  ;;  %v3743_v30 = vld [vmem:[%s5213_s4 + $0x124] ss:$16 sps:$4 sm:$0xff]   ;;  %v3746_v53 = vld [vmem:[%s5213_s4 + $0x12c] ss:$16 sps:$4 sm:$0xff]   ;;  %v3741_v21 = vld [vmem:[%s5213_s4 + $0x120] ss:$16 sps:$4 sm:$0xff]  }
 0x16b   :  { %2578 = vmatprep.subr.bf16.mxu0 %v3689_v1  ;;  %2737 = vmatprep.subr.bf16.mxu1 %v3692_v45  ;;  %v3744_v44 = vld [vmem:[%s5213_s4 + $0x128] ss:$16 sps:$4 sm:$0xff]   ;;  %v3749_v43 = vld [vmem:[%s5213_s4 + $0x144] ss:$16 sps:$4 sm:$0xff]   ;;  %v3752_v15 = vld [vmem:[%s5213_s4 + $0x14c] ss:$16 sps:$4 sm:$0xff]  }
 0x16c   :  { %v3747_v23 = vld [vmem:[%s5213_s4 + $0x140] ss:$16 sps:$4 sm:$0xff]   ;;  %v3750_v31 = vld [vmem:[%s5213_s4 + $0x148] ss:$16 sps:$4 sm:$0xff]   ;;  %v3755_v13 = vld [vmem:[%s5213_s4 + $0x164] ss:$16 sps:$4 sm:$0xff]  }
 0x16d   :  { %3224 = vmatmul.mubr.msk.bf16.vlgmr.msra.gmra.mrb[16].mxu0 %vm1215_vm3, %v3685_v6  ;;  %3226 = vmatmul.mubr.msk.bf16.vlgmr.msra.gmra.mrb[16].mxu1 %vm1215_vm3, %v3685_v6  ;;  %v3758_v14 = vld [vmem:[%s5213_s4 + $0x16c] ss:$16 sps:$4 sm:$0xff]   ;;  %v3753_v19 = vld [vmem:[%s5213_s4 + $0x160] ss:$16 sps:$4 sm:$0xff]   ;;  %v3756_v22 = vld [vmem:[%s5213_s4 + $0x168] ss:$16 sps:$4 sm:$0xff]  }
 0x16e   :  { %1280 = vmatprep.mubr.bf16.mxu0 %v3976_v59  ;;  %1333 = vmatprep.mubr.bf16.mxu1 %v3976_v59  ;;  %v3761_v36 = vld [vmem:[%s5213_s4 + $0x184] ss:$16 sps:$4 sm:$0xff]   ;;  %v3764_v48 = vld [vmem:[%s5213_s4 + $0x18c] ss:$16 sps:$4 sm:$0xff]   ;;  %v3759_v24 = vld [vmem:[%s5213_s4 + $0x180] ss:$16 sps:$4 sm:$0xff]  }
 0x16f   :  { %2579 = vmatpush1.bf16.msra.mxu0 %v3687_v7  ;;  %2738 = vmatpush1.bf16.msra.mxu1 %v3690_v26  ;;  %v3762_v37 = vld [vmem:[%s5213_s4 + $0x188] ss:$16 sps:$4 sm:$0xff]   ;;  %v3767_v25 = vld [vmem:[%s5213_s4 + $0x1a4] ss:$16 sps:$4 sm:$0xff]   ;;  %v3770_v1 = vld [vmem:[%s5213_s4 + $0x1ac] ss:$16 sps:$4 sm:$0xff]  }
 0x170   :  { %2580 = vmatprep.subr.bf16.mxu0 %v3695_v28  ;;  %2739 = vmatprep.subr.bf16.mxu1 %v3698_v57  ;;  %v3765_v45 = vld [vmem:[%s5213_s4 + $0x1a0] ss:$16 sps:$4 sm:$0xff]   ;;  %v3768_v52 = vld [vmem:[%s5213_s4 + $0x1a8] ss:$16 sps:$4 sm:$0xff]   ;;  %v3773_v6 = vld [vmem:[%s5213_s4 + $0x1c4] ss:$16 sps:$4 sm:$0xff]  }
 0x171   :  { %v3771_v47 = vld [vmem:[%s5213_s4 + $0x1c0] ss:$16 sps:$4 sm:$0xff]   ;;  %v3774_v7 = vld [vmem:[%s5213_s4 + $0x1c8] ss:$16 sps:$4 sm:$0xff]   ;;  %v3776_v26 = vld [vmem:[%s5213_s4 + $0x1cc] ss:$16 sps:$4 sm:$0xff]  }
 0x172   :  { %v3777_v28 = vld [vmem:[%s5213_s4 + $0x1e0] ss:$16 sps:$4 sm:$0xff]   ;;  %v3779_v57 = vld [vmem:[%s5213_s4 + $0x1e4] ss:$16 sps:$4 sm:$0xff]  }
 0x173   :  { %2581 = vmatpush1.bf16.msra.mxu0 %v3693_v27  ;;  %2740 = vmatpush1.bf16.msra.mxu1 %v3696_v29  ;;  %v3780_v27 = vld [vmem:[%s5213_s4 + $0x1e8] ss:$16 sps:$4 sm:$0xff]   ;;  %v3782_v29 = vld [vmem:[%s5213_s4 + $0x1ec] ss:$16 sps:$4 sm:$0xff]  }
 0x174   :  { %2582 = vmatprep.subr.bf16.mxu0 %v3701_v8  ;;  %2741 = vmatprep.subr.bf16.mxu1 %v3704_v49  ;;  %v3785_v8 = vld [vmem:[%s5213_s4 + $0x204] ss:$16 sps:$4 sm:$0xff]   ;;  %v3788_v49 = vld [vmem:[%s5213_s4 + $0x20c] ss:$16 sps:$4 sm:$0xff]  }
 0x175   :  { %3225 = vmatmul.mubr.msk.bf16.gmra.mrb[20].mxu0 %vm1215_vm3, %v3686_v34  ;;  %3227 = vmatmul.mubr.msk.bf16.gmra.mrb[20].mxu1 %vm1215_vm3, %v3686_v34 }
 0x177   :  { %2583 = vmatpush1.bf16.msra.mxu0 %v3699_v35  ;;  %2742 = vmatpush1.bf16.msra.mxu1 %v3702_v40 }
 0x178   :  { %2584 = vmatprep.subr.bf16.mxu0 %v3707_v9  ;;  %2743 = vmatprep.subr.bf16.mxu1 %v3710_v41 }
 0x17b   :  { %2585 = vmatpush1.bf16.msra.mxu0 %v3705_v62  ;;  %2744 = vmatpush1.bf16.msra.mxu1 %v3708_v58 }
 0x17c   :  { %2586 = vmatprep.subr.bf16.mxu0 %v3713_v32  ;;  %2745 = vmatprep.subr.bf16.mxu1 %v3716_v46 }
 0x17f   :  { %2587 = vmatpush1.bf16.msra.mxu0 %v3711_v54  ;;  %2746 = vmatpush1.bf16.msra.mxu1 %v3714_v33 }
 0x180   :  { %2588 = vmatprep.subr.bf16.mxu0 %v3719_v63  ;;  %2747 = vmatprep.subr.bf16.mxu1 %v3722_v11 }
 0x183   :  { %2589 = vmatpush1.bf16.msra.mxu0 %v3717_v56  ;;  %2748 = vmatpush1.bf16.msra.mxu1 %v3720_v42  ;;  %v3783_v42 = vld [vmem:[%s5213_s4 + $0x200] ss:$16 sps:$4 sm:$0xff]  }
 0x184   :  { %2590 = vmatprep.subr.bf16.mxu0 %v3725_v12  ;;  %2749 = vmatprep.subr.bf16.mxu1 %v3728_v50  ;;  %v3786_v12 = vld [vmem:[%s5213_s4 + $0x208] ss:$16 sps:$4 sm:$0xff]   ;;  %v3791_v50 = vld [vmem:[%s5213_s4 + $0x224] ss:$16 sps:$4 sm:$0xff]  }
 0x187   :  { %2591 = vmatpush1.bf16.msra.mxu0 %v3723_v61  ;;  %2750 = vmatpush1.bf16.msra.mxu1 %v3726_v55  ;;  %v3794_v61 = vld [vmem:[%s5213_s4 + $0x22c] ss:$16 sps:$4 sm:$0xff]  }
 0x188   :  { %2592 = vmatprep.subr.bf16.mxu0 %v3731_v10  ;;  %2751 = vmatprep.subr.bf16.mxu1 %v3734_v16 }
 0x18b   :  { %2593 = vmatpush1.bf16.msra.mxu0 %v3729_v17  ;;  %2752 = vmatpush1.bf16.msra.mxu1 %v3732_v38  ;;  %v3789_v38 = vld [vmem:[%s5213_s4 + $0x220] ss:$16 sps:$4 sm:$0xff]  }
 0x18c   :  { %2594 = vmatprep.subr.bf16.mxu0 %v3737_v60  ;;  %2753 = vmatprep.subr.bf16.mxu1 %v3740_v18 }
 0x18f   :  { %2595 = vmatpush1.bf16.msra.mxu0 %v3735_v20  ;;  %2754 = vmatpush1.bf16.msra.mxu1 %v3738_v39  ;;  %v3792_v39 = vld [vmem:[%s5213_s4 + $0x228] ss:$16 sps:$4 sm:$0xff]  }
 0x190   :  { %2596 = vmatprep.subr.bf16.mxu0 %v3743_v30  ;;  %2755 = vmatprep.subr.bf16.mxu1 %v3746_v53 }
 0x193   :  { %2597 = vmatpush1.bf16.msra.mxu0 %v3741_v21  ;;  %2756 = vmatpush1.bf16.msra.mxu1 %v3744_v44 }
 0x194   :  { %2598 = vmatprep.subr.bf16.mxu0 %v3749_v43  ;;  %2757 = vmatprep.subr.bf16.mxu1 %v3752_v15  ;;  %v3797_v15 = vld [vmem:[%s5213_s4 + $0x244] ss:$16 sps:$4 sm:$0xff]  }
 0x197   :  { %2599 = vmatpush1.bf16.msra.mxu0 %v3747_v23  ;;  %2758 = vmatpush1.bf16.msra.mxu1 %v3750_v31  ;;  %v3800_v23 = vld [vmem:[%s5213_s4 + $0x24c] ss:$16 sps:$4 sm:$0xff]  }
 0x198   :  { %2600 = vmatprep.subr.bf16.mxu0 %v3755_v13  ;;  %2759 = vmatprep.subr.bf16.mxu1 %v3758_v14 }
 0x19b   :  { %2601 = vmatpush1.bf16.msra.mxu0 %v3753_v19  ;;  %2760 = vmatpush1.bf16.msra.mxu1 %v3756_v22  ;;  %v3795_v19 = vld [vmem:[%s5213_s4 + $0x240] ss:$16 sps:$4 sm:$0xff]  }
 0x19c   :  { %2602 = vmatprep.subr.bf16.mxu0 %v3761_v36  ;;  %2761 = vmatprep.subr.bf16.mxu1 %v3764_v48  ;;  %v3798_v48 = vld [vmem:[%s5213_s4 + $0x248] ss:$16 sps:$4 sm:$0xff]  }
 0x19f   :  { %2603 = vmatpush1.bf16.msra.mxu0 %v3759_v24  ;;  %2762 = vmatpush1.bf16.msra.mxu1 %v3762_v37  ;;  %v3803_v24 = vld [vmem:[%s5213_s4 + $0x264] ss:$16 sps:$4 sm:$0xff]  }
 0x1a0   :  { %2604 = vmatprep.subr.bf16.mxu0 %v3767_v25  ;;  %2763 = vmatprep.subr.bf16.mxu1 %v3770_v1  ;;  %v3806_v25 = vld [vmem:[%s5213_s4 + $0x26c] ss:$16 sps:$4 sm:$0xff]  }
 0x1a3   :  { %2605 = vmatpush1.bf16.msra.mxu0 %v3765_v45  ;;  %2764 = vmatpush1.bf16.msra.mxu1 %v3768_v52 }
 0x1a4   :  { %2606 = vmatprep.subr.bf16.mxu0 %v3773_v6  ;;  %2765 = vmatprep.subr.bf16.mxu1 %v3776_v26 }
 0x1a7   :  { %2607 = vmatpush1.bf16.msra.mxu0 %v3771_v47  ;;  %2766 = vmatpush1.bf16.msra.mxu1 %v3774_v7 }
 0x1a8   :  { %2608 = vmatprep.subr.bf16.mxu0 %v3779_v57  ;;  %2767 = vmatprep.subr.bf16.mxu1 %v3782_v29 }
 0x1ab   :  { %2609 = vmatpush1.bf16.msra.mxu0 %v3777_v28  ;;  %2768 = vmatpush1.bf16.msra.mxu1 %v3780_v27 }
 0x1ac   :  { %2631 = vmatprep.subr.bf16.mxu0 %v3785_v8  ;;  %2790 = vmatprep.subr.bf16.mxu1 %v3788_v49  ;;  %v3801_v8 = vld [vmem:[%s5213_s4 + $0x260] ss:$16 sps:$4 sm:$0xff]   ;;  %v3804_v49 = vld [vmem:[%s5213_s4 + $0x268] ss:$16 sps:$4 sm:$0xff]  }
 0x240   :  { %v1272_v34 = vpop.f32.mrb[16].mxu0  ;;  %v1325_v35 = vpop.f32.mrb[16].mxu1 }
 0x241   :  { %v1274_v40 = vpop.f32.mrb[17].mxu0  ;;  %v1327_v9 = vpop.f32.mrb[17].mxu1 }
 0x242   :  { %v1276_v41 = vpop.f32.mrb[18].mxu0  ;;  %v1329_v62 = vpop.f32.mrb[18].mxu1 }
 0x243   :  { %v1344_v58 = vpack.c.bf16 %v1276_v41, %v1272_v34  ;;  %v1346_v32 = vpack.c.bf16 %v1329_v62, %v1325_v35  ;;  %v1278_v46 = vpop.f32.mrb[19].mxu0  ;;  %v1331_v54 = vpop.f32.mrb[19].mxu1  ;;  %v3812_v41 = vld [vmem:[%s5213_s4 + $0x28c] ss:$16 sps:$4 sm:$0xff]  }
 0x244   :  { %v1345_v33 = vpack.c.bf16 %v1278_v46, %v1274_v40  ;;  %v1347_v63 = vpack.c.bf16 %v1331_v54, %v1327_v9  ;;  %v3809_v9 = vld [vmem:[%s5213_s4 + $0x284] ss:$16 sps:$4 sm:$0xff]   ;;  %v3810_v46 = vld [vmem:[%s5213_s4 + $0x288] ss:$16 sps:$4 sm:$0xff]  }
 0x245   :  { %v1352_v11 = vmax.bf16 %v1346_v32, %v1344_v58  ;;  %v3807_v32 = vld [vmem:[%s5213_s4 + $0x280] ss:$16 sps:$4 sm:$0xff]   ;;  %v3815_v54 = vld [vmem:[%s5213_s4 + $0x2a4] ss:$16 sps:$4 sm:$0xff]  }
 0x246   :  { %v4723_v56 = vmax.bf16 %v1347_v63, %v1345_v33  ;;  %v3818_v33 = vld [vmem:[%s5213_s4 + $0x2ac] ss:$16 sps:$4 sm:$0xff]   ;;  %v3813_v63 = vld [vmem:[%s5213_s4 + $0x2a0] ss:$16 sps:$4 sm:$0xff]  }
 0x247   :  { %v1359_v60 = vshll.u32 %v1352_v11, 16  ;;  %v1357_v1 = vshrl.u32 %v1352_v11, 16  ;;  %v1394_v52 = vrot.slane %v1352_v11, 1 }
 0x248   :  { %v1282_v55 = vpop.f32.mrb[20].mxu0  ;;  %v1335_v10 = vpop.f32.mrb[20].mxu1  ;;  %2610 = vmatprep.mubr.bf16.mxu0 %v4723_v56  ;;  %2769 = vmatprep.mubr.bf16.mxu1 %v4723_v56  ;;  %v1371_v30 = vshll.u32 %v4723_v56, 16  ;;  %v1369_v6 = vshrl.u32 %v4723_v56, 16  ;;  %v1397_v26 = vrot.slane %v4723_v56, 1 }
 0x249   :  { %v1284_v16 = vpop.f32.mrb[21].mxu0  ;;  %v1337_v17 = vpop.f32.mrb[21].mxu1  ;;  %2611 = vmatmul.mubr.bf16.vlgmr.msra.gmra.mrb[24].mxu0 %v1352_v11  ;;  %2770 = vmatmul.mubr.bf16.vlgmr.msra.gmra.mrb[24].mxu1 %v1352_v11  ;;  %v1361_v22 = vrot.slane %v1359_v60, 1  ;;  %v3816_v11 = vld [vmem:[%s5213_s4 + $0x2a8] ss:$16 sps:$4 sm:$0xff]  }
 0x24a   :  { %2632 = vmatpush1.bf16.msra.mxu0 %v3783_v42  ;;  %2791 = vmatpush1.bf16.msra.mxu1 %v3786_v12  ;;  %v1286_v18 = vpop.f32.mrb[22].mxu0  ;;  %v1339_v20 = vpop.f32.mrb[22].mxu1  ;;  %v1373_v37 = vrot.slane %v1371_v30, 1  ;;  %v3821_v56 = vld [vmem:[%s5213_s4 + $0x2c4] ss:$16 sps:$4 sm:$0xff]  }
 0x24b   :  { %v1348_v53 = vpack.c.bf16 %v1286_v18, %v1282_v55  ;;  %v1350_v21 = vpack.c.bf16 %v1339_v20, %v1335_v10  ;;  %v1288_v44 = vpop.f32.mrb[23].mxu0  ;;  %v1341_v43 = vpop.f32.mrb[23].mxu1  ;;  %2633 = vmatprep.subr.bf16.mxu0 %v3791_v50  ;;  %2792 = vmatprep.subr.bf16.mxu1 %v3794_v61  ;;  %v1362_v57 = vor.u32 %v1361_v22, %v1357_v1  ;;  %v3824_v42 = vld [vmem:[%s5213_s4 + $0x2cc] ss:$16 sps:$4 sm:$0xff]   ;;  %v3819_v12 = vld [vmem:[%s5213_s4 + $0x2c0] ss:$16 sps:$4 sm:$0xff]  }
 0x24c   :  { %v1349_v31 = vpack.c.bf16 %v1288_v44, %v1284_v16  ;;  %v1351_v13 = vpack.c.bf16 %v1341_v43, %v1337_v17  ;;  %v1374_v34 = vor.u32 %v1373_v37, %v1369_v6  ;;  %v3822_v50 = vld [vmem:[%s5213_s4 + $0x2c8] ss:$16 sps:$4 sm:$0xff]   ;;  %v3827_v61 = vld [vmem:[%s5213_s4 + $0x2e4] ss:$16 sps:$4 sm:$0xff]   ;;  %v3830_v55 = vld [vmem:[%s5213_s4 + $0x2ec] ss:$16 sps:$4 sm:$0xff]  }
 0x24d   :  { %v4752_v14 = vmax.bf16 %v1350_v21, %v1348_v53  ;;  %v3825_v10 = vld [vmem:[%s5213_s4 + $0x2e0] ss:$16 sps:$4 sm:$0xff]   ;;  %v3828_v16 = vld [vmem:[%s5213_s4 + $0x2e8] ss:$16 sps:$4 sm:$0xff]   ;;  %v3833_v17 = vld [vmem:[%s5213_s4 + $0x304] ss:$16 sps:$4 sm:$0xff]  }
 0x24e   :  { %v4757_v36 = vmax.bf16 %v1351_v13, %v1349_v31  ;;  %2634 = vmatpush1.bf16.msra.mxu0 %v3789_v38  ;;  %2793 = vmatpush1.bf16.msra.mxu1 %v3792_v39  ;;  %v3836_v38 = vld [vmem:[%s5213_s4 + $0x30c] ss:$16 sps:$4 sm:$0xff]   ;;  %v3831_v60 = vld [vmem:[%s5213_s4 + $0x300] ss:$16 sps:$4 sm:$0xff]   ;;  %v3834_v18 = vld [vmem:[%s5213_s4 + $0x308] ss:$16 sps:$4 sm:$0xff]  }
 0x24f   :  { %2635 = vmatprep.subr.bf16.mxu0 %v3797_v15  ;;  %2794 = vmatprep.subr.bf16.mxu1 %v3800_v23  ;;  %v1364_v45 = vshll.u32 %v4752_v14, 16  ;;  %v4770_v47 = vrot.slane %v4752_v14, 1  ;;  %v3839_v20 = vld [vmem:[%s5213_s4 + $0x324] ss:$16 sps:$4 sm:$0xff]   ;;  %v3842_v39 = vld [vmem:[%s5213_s4 + $0x32c] ss:$16 sps:$4 sm:$0xff]  }
 0x250   :  { %2620 = vmatprep.mubr.bf16.mxu0 %v4757_v36  ;;  %2779 = vmatprep.mubr.bf16.mxu1 %v4757_v36  ;;  %v1376_v7 = vshll.u32 %v4757_v36, 16  ;;  %v4778_v28 = vrot.slane %v4757_v36, 1  ;;  %v3837_v30 = vld [vmem:[%s5213_s4 + $0x320] ss:$16 sps:$4 sm:$0xff]   ;;  %v3840_v53 = vld [vmem:[%s5213_s4 + $0x328] ss:$16 sps:$4 sm:$0xff]  }
 0x251   :  { %2621 = vmatmul.mubr.bf16.gmra.mrb[28].mxu0 %v4752_v14  ;;  %2780 = vmatmul.mubr.bf16.gmra.mrb[28].mxu1 %v4752_v14  ;;  %v4782_v27 = vrot.slane %v1364_v45, 1  ;;  %v4786_v29 = vsel %vm95_vm1, %v1394_v52, %v4770_v47  ;;  %v3845_v21 = vld [vmem:[%s5213_s4 + $0x344] ss:$16 sps:$4 sm:$0xff]   ;;  %v3848_v44 = vld [vmem:[%s5213_s4 + $0x34c] ss:$16 sps:$4 sm:$0xff]  }
 0x252   :  { %2636 = vmatpush1.bf16.msra.mxu0 %v3795_v19  ;;  %2795 = vmatpush1.bf16.msra.mxu1 %v3798_v48  ;;  %v4794_v35 = vrot.slane %v1376_v7, 1  ;;  %v4798_v40 = vsel %vm95_vm1, %v1397_v26, %v4778_v28  ;;  %v3843_v43 = vld [vmem:[%s5213_s4 + $0x340] ss:$16 sps:$4 sm:$0xff]   ;;  %v3846_v15 = vld [vmem:[%s5213_s4 + $0x348] ss:$16 sps:$4 sm:$0xff]  }
 0x253   :  { %2637 = vmatprep.subr.bf16.mxu0 %v3803_v24  ;;  %2796 = vmatprep.subr.bf16.mxu1 %v3806_v25  ;;  %v4808_v62 = vsel %vm59_vm0, %v1362_v57, %v4782_v27  ;;  %v3851_v23 = vld [vmem:[%s5213_s4 + $0x364] ss:$16 sps:$4 sm:$0xff]   ;;  %v3854_v31 = vld [vmem:[%s5213_s4 + $0x36c] ss:$16 sps:$4 sm:$0xff]   ;;  %v3849_v13 = vld [vmem:[%s5213_s4 + $0x360] ss:$16 sps:$4 sm:$0xff]  }
 0x254   :  { %v1379_v58 = vsel %vm59_vm0, %v1374_v34, %v4794_v35  ;;  %v3852_v19 = vld [vmem:[%s5213_s4 + $0x368] ss:$16 sps:$4 sm:$0xff]   ;;  %v3857_v22 = vld [vmem:[%s5213_s4 + $0x384] ss:$16 sps:$4 sm:$0xff]   ;;  %v3860_v48 = vld [vmem:[%s5213_s4 + $0x38c] ss:$16 sps:$4 sm:$0xff]  }
 0x255   :  { %2663 = vmatprep.mubr.bf16.mxu0 %v1379_v58  ;;  %2822 = vmatprep.mubr.bf16.mxu1 %v1379_v58  ;;  %v3855_v24 = vld [vmem:[%s5213_s4 + $0x380] ss:$16 sps:$4 sm:$0xff]   ;;  %v3858_v37 = vld [vmem:[%s5213_s4 + $0x388] ss:$16 sps:$4 sm:$0xff]   ;;  %v3863_v25 = vld [vmem:[%s5213_s4 + $0x3a4] ss:$16 sps:$4 sm:$0xff]  }
 0x256   :  { %2638 = vmatpush1.bf16.msra.mxu0 %v3801_v8  ;;  %2797 = vmatpush1.bf16.msra.mxu1 %v3804_v49  ;;  %v3866_v1 = vld [vmem:[%s5213_s4 + $0x3ac] ss:$16 sps:$4 sm:$0xff]   ;;  %v3861_v45 = vld [vmem:[%s5213_s4 + $0x3a0] ss:$16 sps:$4 sm:$0xff]   ;;  %v3864_v52 = vld [vmem:[%s5213_s4 + $0x3a8] ss:$16 sps:$4 sm:$0xff]  }
 0x257   :  { %2639 = vmatprep.subr.bf16.mxu0 %v3809_v9  ;;  %2798 = vmatprep.subr.bf16.mxu1 %v3812_v41  ;;  %v3869_v6 = vld [vmem:[%s5213_s4 + $0x3c4] ss:$16 sps:$4 sm:$0xff]   ;;  %v3872_v7 = vld [vmem:[%s5213_s4 + $0x3cc] ss:$16 sps:$4 sm:$0xff]   ;;  %v3867_v26 = vld [vmem:[%s5213_s4 + $0x3c0] ss:$16 sps:$4 sm:$0xff]  }
 0x258   :  { %v3870_v57 = vld [vmem:[%s5213_s4 + $0x3c8] ss:$16 sps:$4 sm:$0xff]   ;;  %v3875_v8 = vld [vmem:[%s5213_s4 + $0x3e4] ss:$16 sps:$4 sm:$0xff]   ;;  %v3878_v49 = vld [vmem:[%s5213_s4 + $0x3ec] ss:$16 sps:$4 sm:$0xff]  }
 0x259   :  { %v3873_v34 = vld [vmem:[%s5213_s4 + $0x3e0] ss:$16 sps:$4 sm:$0xff]   ;;  %v3876_v9 = vld [vmem:[%s5213_s4 + $0x3e8] ss:$16 sps:$4 sm:$0xff]   ;;  %v3881_v41 = vld [vmem:[%s5213_s4 + $0x404] ss:$16 sps:$4 sm:$0xff]  }
 0x25a   :  { %2640 = vmatpush1.bf16.msra.mxu0 %v3807_v32  ;;  %2799 = vmatpush1.bf16.msra.mxu1 %v3810_v46  ;;  %v3884_v58 = vld [vmem:[%s5213_s4 + $0x40c] ss:$16 sps:$4 sm:$0xff]   ;;  %v1383_v32 = vshrl.u32 %v4757_v36, 16  ;;  %v3879_v46 = vld [vmem:[%s5213_s4 + $0x400] ss:$16 sps:$4 sm:$0xff]  }
 0x25b   :  { %2641 = vmatprep.subr.bf16.mxu0 %v3815_v54  ;;  %2800 = vmatprep.subr.bf16.mxu1 %v3818_v33  ;;  %v3882_v54 = vld [vmem:[%s5213_s4 + $0x408] ss:$16 sps:$4 sm:$0xff]   ;;  %v3890_v36 = vld [vmem:[%s5213_s4 + $0x42c] ss:$16 sps:$4 sm:$0xff]  }
 0x25c   :  { %v1385_v33 = vor.u32 %v1383_v32, %v4794_v35  ;;  %v3888_v35 = vld [vmem:[%s5213_s4 + $0x428] ss:$16 sps:$4 sm:$0xff]   ;;  %v3959_v32 = vld [vmem:[%s5213_s4 + $0x5a4] ss:$16 sps:$4 sm:$0xff]  }
 0x25e   :  { %2642 = vmatpush1.bf16.msra.mxu0 %v3813_v63  ;;  %2801 = vmatpush1.bf16.msra.mxu1 %v3816_v11  ;;  %v3887_v63 = vld [vmem:[%s5213_s4 + $0x424] ss:$16 sps:$4 sm:$0xff]   ;;  %v3885_v11 = vld [vmem:[%s5213_s4 + $0x420] ss:$16 sps:$4 sm:$0xff]  }
 0x25f   :  { %2643 = vmatprep.subr.bf16.mxu0 %v3821_v56  ;;  %2802 = vmatprep.subr.bf16.mxu1 %v3824_v42  ;;  %v1380_v56 = vshrl.u32 %v4752_v14, 16  ;;  %v3893_v42 = vld [vmem:[%s5213_s4 + $0x444] ss:$16 sps:$4 sm:$0xff]   ;;  %v3894_v14 = vld [vmem:[%s5213_s4 + $0x448] ss:$16 sps:$4 sm:$0xff]  }
 0x262   :  { %2644 = vmatpush1.bf16.msra.mxu0 %v3819_v12  ;;  %2803 = vmatpush1.bf16.msra.mxu1 %v3822_v50  ;;  %v3891_v12 = vld [vmem:[%s5213_s4 + $0x440] ss:$16 sps:$4 sm:$0xff]   ;;  %v1382_v50 = vor.u32 %v1380_v56, %v4782_v27  ;;  %v3971_v56 = vld [vmem:[%s5213_s4 + $0x5e4] ss:$16 sps:$4 sm:$0xff]  }
 0x263   :  { %2645 = vmatprep.subr.bf16.mxu0 %v3827_v61  ;;  %2804 = vmatprep.subr.bf16.mxu1 %v3830_v55  ;;  %v3899_v61 = vld [vmem:[%s5213_s4 + $0x464] ss:$16 sps:$4 sm:$0xff]   ;;  %v3902_v55 = vld [vmem:[%s5213_s4 + $0x46c] ss:$16 sps:$4 sm:$0xff]   ;;  %v3897_v27 = vld [vmem:[%s5213_s4 + $0x460] ss:$16 sps:$4 sm:$0xff]  }
 0x266   :  { %2646 = vmatpush1.bf16.msra.mxu0 %v3825_v10  ;;  %2805 = vmatpush1.bf16.msra.mxu1 %v3828_v16  ;;  %v3900_v10 = vld [vmem:[%s5213_s4 + $0x468] ss:$16 sps:$4 sm:$0xff]   ;;  %v3905_v16 = vld [vmem:[%s5213_s4 + $0x484] ss:$16 sps:$4 sm:$0xff]  }
 0x267   :  { %2647 = vmatprep.subr.bf16.mxu0 %v3833_v17  ;;  %2806 = vmatprep.subr.bf16.mxu1 %v3836_v38  ;;  %v3908_v17 = vld [vmem:[%s5213_s4 + $0x48c] ss:$16 sps:$4 sm:$0xff]   ;;  %v3903_v38 = vld [vmem:[%s5213_s4 + $0x480] ss:$16 sps:$4 sm:$0xff]  }
 0x26a   :  { %2648 = vmatpush1.bf16.msra.mxu0 %v3831_v60  ;;  %2807 = vmatpush1.bf16.msra.mxu1 %v3834_v18  ;;  %v3911_v60 = vld [vmem:[%s5213_s4 + $0x4a4] ss:$16 sps:$4 sm:$0xff]   ;;  %v3914_v18 = vld [vmem:[%s5213_s4 + $0x4ac] ss:$16 sps:$4 sm:$0xff]  }
 0x26b   :  { %2649 = vmatprep.subr.bf16.mxu0 %v3839_v20  ;;  %2808 = vmatprep.subr.bf16.mxu1 %v3842_v39  ;;  %v3909_v20 = vld [vmem:[%s5213_s4 + $0x4a0] ss:$16 sps:$4 sm:$0xff]   ;;  %v3912_v39 = vld [vmem:[%s5213_s4 + $0x4a8] ss:$16 sps:$4 sm:$0xff]  }
 0x26e   :  { %2650 = vmatpush1.bf16.msra.mxu0 %v3837_v30  ;;  %2809 = vmatpush1.bf16.msra.mxu1 %v3840_v53  ;;  %v3917_v30 = vld [vmem:[%s5213_s4 + $0x4c4] ss:$16 sps:$4 sm:$0xff]   ;;  %v3920_v53 = vld [vmem:[%s5213_s4 + $0x4cc] ss:$16 sps:$4 sm:$0xff]  }
 0x26f   :  { %2651 = vmatprep.subr.bf16.mxu0 %v3845_v21  ;;  %2810 = vmatprep.subr.bf16.mxu1 %v3848_v44  ;;  %v3915_v21 = vld [vmem:[%s5213_s4 + $0x4c0] ss:$16 sps:$4 sm:$0xff]   ;;  %v3918_v44 = vld [vmem:[%s5213_s4 + $0x4c8] ss:$16 sps:$4 sm:$0xff]  }
 0x272   :  { %2652 = vmatpush1.bf16.msra.mxu0 %v3843_v43  ;;  %2811 = vmatpush1.bf16.msra.mxu1 %v3846_v15  ;;  %v3923_v43 = vld [vmem:[%s5213_s4 + $0x4e4] ss:$16 sps:$4 sm:$0xff]   ;;  %v3926_v15 = vld [vmem:[%s5213_s4 + $0x4ec] ss:$16 sps:$4 sm:$0xff]  }
 0x273   :  { %2653 = vmatprep.subr.bf16.mxu0 %v3851_v23  ;;  %2812 = vmatprep.subr.bf16.mxu1 %v3854_v31  ;;  %v3921_v23 = vld [vmem:[%s5213_s4 + $0x4e0] ss:$16 sps:$4 sm:$0xff]   ;;  %v3924_v31 = vld [vmem:[%s5213_s4 + $0x4e8] ss:$16 sps:$4 sm:$0xff]  }
 0x276   :  { %2654 = vmatpush1.bf16.msra.mxu0 %v3849_v13  ;;  %2813 = vmatpush1.bf16.msra.mxu1 %v3852_v19  ;;  %v3929_v13 = vld [vmem:[%s5213_s4 + $0x504] ss:$16 sps:$4 sm:$0xff]   ;;  %v3932_v19 = vld [vmem:[%s5213_s4 + $0x50c] ss:$16 sps:$4 sm:$0xff]  }
 0x277   :  { %2655 = vmatprep.subr.bf16.mxu0 %v3857_v22  ;;  %2814 = vmatprep.subr.bf16.mxu1 %v3860_v48  ;;  %v3927_v22 = vld [vmem:[%s5213_s4 + $0x500] ss:$16 sps:$4 sm:$0xff]   ;;  %v3930_v48 = vld [vmem:[%s5213_s4 + $0x508] ss:$16 sps:$4 sm:$0xff]  }
 0x27a   :  { %2656 = vmatpush1.bf16.msra.mxu0 %v3855_v24  ;;  %2815 = vmatpush1.bf16.msra.mxu1 %v3858_v37  ;;  %v3935_v24 = vld [vmem:[%s5213_s4 + $0x524] ss:$16 sps:$4 sm:$0xff]   ;;  %v3938_v37 = vld [vmem:[%s5213_s4 + $0x52c] ss:$16 sps:$4 sm:$0xff]  }
 0x27b   :  { %2657 = vmatprep.subr.bf16.mxu0 %v3863_v25  ;;  %2816 = vmatprep.subr.bf16.mxu1 %v3866_v1  ;;  %v3933_v25 = vld [vmem:[%s5213_s4 + $0x520] ss:$16 sps:$4 sm:$0xff]   ;;  %v3936_v1 = vld [vmem:[%s5213_s4 + $0x528] ss:$16 sps:$4 sm:$0xff]  }
 0x27e   :  { %2658 = vmatpush1.bf16.msra.mxu0 %v3861_v45  ;;  %2817 = vmatpush1.bf16.msra.mxu1 %v3864_v52  ;;  %v3941_v45 = vld [vmem:[%s5213_s4 + $0x544] ss:$16 sps:$4 sm:$0xff]   ;;  %v3944_v52 = vld [vmem:[%s5213_s4 + $0x54c] ss:$16 sps:$4 sm:$0xff]  }
 0x27f   :  { %2659 = vmatprep.subr.bf16.mxu0 %v3869_v6  ;;  %2818 = vmatprep.subr.bf16.mxu1 %v3872_v7  ;;  %v3939_v6 = vld [vmem:[%s5213_s4 + $0x540] ss:$16 sps:$4 sm:$0xff]   ;;  %v3942_v7 = vld [vmem:[%s5213_s4 + $0x548] ss:$16 sps:$4 sm:$0xff]  }
 0x282   :  { %2660 = vmatpush1.bf16.msra.mxu0 %v3867_v26  ;;  %2819 = vmatpush1.bf16.msra.mxu1 %v3870_v57  ;;  %v3947_v26 = vld [vmem:[%s5213_s4 + $0x564] ss:$16 sps:$4 sm:$0xff]   ;;  %v3950_v57 = vld [vmem:[%s5213_s4 + $0x56c] ss:$16 sps:$4 sm:$0xff]  }
 0x283   :  { %2661 = vmatprep.subr.bf16.mxu0 %v3875_v8  ;;  %2820 = vmatprep.subr.bf16.mxu1 %v3878_v49  ;;  %v3945_v8 = vld [vmem:[%s5213_s4 + $0x560] ss:$16 sps:$4 sm:$0xff]   ;;  %v3948_v49 = vld [vmem:[%s5213_s4 + $0x568] ss:$16 sps:$4 sm:$0xff]  }
 0x286   :  { %2662 = vmatpush1.bf16.msra.mxu0 %v3873_v34  ;;  %2821 = vmatpush1.bf16.msra.mxu1 %v3876_v9  ;;  %v3953_v34 = vld [vmem:[%s5213_s4 + $0x584] ss:$16 sps:$4 sm:$0xff]   ;;  %v3956_v9 = vld [vmem:[%s5213_s4 + $0x58c] ss:$16 sps:$4 sm:$0xff]  }
 0x287   :  { %2684 = vmatprep.subr.bf16.mxu0 %v3881_v41  ;;  %2843 = vmatprep.subr.bf16.mxu1 %v3884_v58  ;;  %v3951_v41 = vld [vmem:[%s5213_s4 + $0x580] ss:$16 sps:$4 sm:$0xff]   ;;  %v3954_v58 = vld [vmem:[%s5213_s4 + $0x588] ss:$16 sps:$4 sm:$0xff]  }
 0x289   :  { %2664 = vmatmul.mubr.bf16.vlgmr.msra.gmra.mrb[24].mxu0 %v4808_v62  ;;  %2823 = vmatmul.mubr.bf16.vlgmr.msra.gmra.mrb[24].mxu1 %v4808_v62  ;;  %v3896_v62 = vld [vmem:[%s5213_s4 + $0x44c] ss:$16 sps:$4 sm:$0xff]  }
 0x28a   :  { %2673 = vmatprep.mubr.bf16.mxu0 %v1385_v33  ;;  %2685 = vmatpush1.bf16.msra.mxu0 %v3879_v46  ;;  %v3962_v46 = vld [vmem:[%s5213_s4 + $0x5ac] ss:$16 sps:$4 sm:$0xff]  }
 0x28b   :  { %2832 = vmatprep.mubr.bf16.mxu1 %v1385_v33  ;;  %2844 = vmatpush1.bf16.msra.mxu1 %v3882_v54  ;;  %v3957_v54 = vld [vmem:[%s5213_s4 + $0x5a0] ss:$16 sps:$4 sm:$0xff]   ;;  %v3960_v33 = vld [vmem:[%s5213_s4 + $0x5a8] ss:$16 sps:$4 sm:$0xff]  }
 0x28c   :  { %2686 = vmatprep.subr.bf16.mxu0 %v3887_v63  ;;  %2845 = vmatprep.subr.bf16.mxu1 %v3890_v36  ;;  %v3965_v63 = vld [vmem:[%s5213_s4 + $0x5c4] ss:$16 sps:$4 sm:$0xff]   ;;  %v3968_v36 = vld [vmem:[%s5213_s4 + $0x5cc] ss:$16 sps:$4 sm:$0xff]  }
 0x28e   :  { %2687 = vmatpush1.bf16.msra.mxu0 %v3885_v11  ;;  %v3963_v11 = vld [vmem:[%s5213_s4 + $0x5c0] ss:$16 sps:$4 sm:$0xff]  }
 0x28f   :  { %2846 = vmatpush1.bf16.msra.mxu1 %v3888_v35  ;;  %2688 = vmatprep.subr.bf16.mxu0 %v3893_v42  ;;  %v3966_v35 = vld [vmem:[%s5213_s4 + $0x5c8] ss:$16 sps:$4 sm:$0xff]   ;;  %v3974_v42 = vld [vmem:[%s5213_s4 + $0x5ec] ss:$16 sps:$4 sm:$0xff]  }
 0x290   :  { %2847 = vmatprep.subr.bf16.mxu1 %v3896_v62  ;;  %v3969_v62 = vld [vmem:[%s5213_s4 + $0x5e0] ss:$16 sps:$4 sm:$0xff]  }
 0x291   :  { %2674 = vmatmul.mubr.bf16.gmra.mrb[28].mxu0 %v1382_v50  ;;  %2833 = vmatmul.mubr.bf16.gmra.mrb[28].mxu1 %v1382_v50  ;;  %v1596_v50 = vld [vmem:[%s5216_s5] sm:$0xf] }
 0x292   :  { %2689 = vmatpush1.bf16.msra.mxu0 %v3891_v12  ;;  %2716 = vmatprep.mubr.bf16.mxu0 %v4798_v40  ;;  %v3972_v12 = vld [vmem:[%s5213_s4 + $0x5e8] ss:$16 sps:$4 sm:$0xff]  }
 0x293   :  { %2848 = vmatpush1.bf16.msra.mxu1 %v3894_v14  ;;  %2875 = vmatprep.mubr.bf16.mxu1 %v4798_v40  ;;  %v3906_v40 = vld [vmem:[%s5213_s4 + $0x488] ss:$16 sps:$4 sm:$0xff]   ;;  %v1601_v14 = vrot.slane %v1596_v50, %v207_v2 }
 0x294   :  { %2690 = vmatprep.subr.bf16.mxu0 %v3899_v61  ;;  %2849 = vmatprep.subr.bf16.mxu1 %v3902_v55 }
 0x296   :  { %2691 = vmatpush1.bf16.msra.mxu0 %v3897_v27 }
 0x297   :  { %2850 = vmatpush1.bf16.msra.mxu1 %v3900_v10  ;;  %2692 = vmatprep.subr.bf16.mxu0 %v3905_v16 }
 0x298   :  { %2851 = vmatprep.subr.bf16.mxu1 %v3908_v17 }
 0x29a   :  { %2693 = vmatpush1.bf16.msra.mxu0 %v3903_v38 }
 0x29b   :  { %2852 = vmatpush1.bf16.msra.mxu1 %v3906_v40  ;;  %2694 = vmatprep.subr.bf16.mxu0 %v3911_v60 }
 0x29c   :  { %2853 = vmatprep.subr.bf16.mxu1 %v3914_v18 }
 0x29e   :  { %2695 = vmatpush1.bf16.msra.mxu0 %v3909_v20 }
 0x29f   :  { %2854 = vmatpush1.bf16.msra.mxu1 %v3912_v39  ;;  %2696 = vmatprep.subr.bf16.mxu0 %v3917_v30 }
 0x2a0   :  { %2855 = vmatprep.subr.bf16.mxu1 %v3920_v53 }
 0x2a2   :  { %2697 = vmatpush1.bf16.msra.mxu0 %v3915_v21 }
 0x2a3   :  { %2856 = vmatpush1.bf16.msra.mxu1 %v3918_v44  ;;  %2698 = vmatprep.subr.bf16.mxu0 %v3923_v43 }
 0x2a4   :  { %2857 = vmatprep.subr.bf16.mxu1 %v3926_v15 }
 0x2a6   :  { %2699 = vmatpush1.bf16.msra.mxu0 %v3921_v23 }
 0x2a7   :  { %2858 = vmatpush1.bf16.msra.mxu1 %v3924_v31  ;;  %2700 = vmatprep.subr.bf16.mxu0 %v3929_v13 }
 0x2a8   :  { %2859 = vmatprep.subr.bf16.mxu1 %v3932_v19 }
 0x2aa   :  { %2701 = vmatpush1.bf16.msra.mxu0 %v3927_v22 }
 0x2ab   :  { %2860 = vmatpush1.bf16.msra.mxu1 %v3930_v48  ;;  %2702 = vmatprep.subr.bf16.mxu0 %v3935_v24 }
 0x2ac   :  { %2861 = vmatprep.subr.bf16.mxu1 %v3938_v37 }
 0x2ae   :  { %2703 = vmatpush1.bf16.msra.mxu0 %v3933_v25 }
 0x2af   :  { %2862 = vmatpush1.bf16.msra.mxu1 %v3936_v1  ;;  %2704 = vmatprep.subr.bf16.mxu0 %v3941_v45 }
 0x2b0   :  { %2863 = vmatprep.subr.bf16.mxu1 %v3944_v52 }
 0x2b2   :  { %2705 = vmatpush1.bf16.msra.mxu0 %v3939_v6 }
 0x2b3   :  { %2864 = vmatpush1.bf16.msra.mxu1 %v3942_v7  ;;  %2706 = vmatprep.subr.bf16.mxu0 %v3947_v26 }
 0x2b4   :  { %2865 = vmatprep.subr.bf16.mxu1 %v3950_v57 }
 0x2b6   :  { %2707 = vmatpush1.bf16.msra.mxu0 %v3945_v8 }
 0x2b7   :  { %2866 = vmatpush1.bf16.msra.mxu1 %v3948_v49  ;;  %2708 = vmatprep.subr.bf16.mxu0 %v3953_v34 }
 0x2b8   :  { %2867 = vmatprep.subr.bf16.mxu1 %v3956_v9 }
 0x2ba   :  { %2709 = vmatpush1.bf16.msra.mxu0 %v3951_v41  ;;  %v3008_v41 = vsel %vm3007_vm4, 4294967295, %v3977_v51 }
 0x2bb   :  { %2868 = vmatpush1.bf16.msra.mxu1 %v3954_v58  ;;  %2710 = vmatprep.subr.bf16.mxu0 %v3959_v32 }
 0x2bc   :  { %2869 = vmatprep.subr.bf16.mxu1 %v3962_v46 }
 0x2be   :  { %2711 = vmatpush1.bf16.msra.mxu0 %v3957_v54 }
 0x2bf   :  { %2870 = vmatpush1.bf16.msra.mxu1 %v3960_v33  ;;  %2712 = vmatprep.subr.bf16.mxu0 %v3965_v63 }
 0x2c0   :  { %2871 = vmatprep.subr.bf16.mxu1 %v3968_v36 }
 0x2c2   :  { %2713 = vmatpush1.bf16.msra.mxu0 %v3963_v11 }
 0x2c3   :  { %2872 = vmatpush1.bf16.msra.mxu1 %v3966_v35  ;;  %2714 = vmatprep.subr.bf16.mxu0 %v3971_v56 }
 0x2c4   :  { %2873 = vmatprep.subr.bf16.mxu1 %v3974_v42 }
 0x2c6   :  { %2715 = vmatpush1.bf16.msra.mxu0 %v3969_v62 }
 0x2c7   :  { %2874 = vmatpush1.bf16.msra.mxu1 %v3972_v12 }
 0x2c9   :  { %2717 = vmatmul.mubr.bf16.vlgmr.msra.gmra.mrb[24].mxu0 %v4786_v29 }
 0x2ca   :  { %2876 = vmatmul.mubr.bf16.vlgmr.msra.gmra.mrb[24].mxu1 %v4786_v29  ;;  %2726 = vmatprep.mubr.bf16.mxu0 %v4778_v28  ;;  %v1609_v29 = vrot.slane %v1596_v50, %v215_v3 }
 0x2cb   :  { %2885 = vmatprep.mubr.bf16.mxu1 %v4778_v28  ;;  %v1605_v28 = vrot.slane %v1596_v50, %v211_v4 }
 0x2d1   :  { %2727 = vmatmul.mubr.bf16.gmra.mrb[28].mxu0 %v4770_v47 }
 0x2d2   :  { %2886 = vmatmul.mubr.bf16.gmra.mrb[28].mxu1 %v4770_v47  ;;  %3054 = vmatprep.mubr.bf16.mxu0 %v3976_v59  ;;  %v1613_v47 = vrot.slane %v1596_v50, %v219_v5 }
 0x2d3   :  { %3097 = vmatprep.mubr.bf16.mxu1 %v3976_v59 }
 0x39c   :  { %v2718_v61 = vpop.f32.mrb[24].mxu0 }
 0x39d   :  { %v3455_v55 = vadd.f32 %v2718_v61, %v1601_v14  ;;  %v2877_v27 = vpop.f32.mrb[24].mxu1  ;;  %v2720_v59 = vpop.f32.mrb[25].mxu0 }
 0x39e   :  { %v3463_v10 = vadd.f32 %v2877_v27, %v1609_v29  ;;  %v3456_v16 = vadd.f32 %v2720_v59, %v1605_v28  ;;  %v2879_v17 = vpop.f32.mrb[25].mxu1  ;;  %v2722_v38 = vpop.f32.mrb[26].mxu0 }
 0x39f   :  { %v3464_v40 = vadd.f32 %v2879_v17, %v1613_v47  ;;  %v3457_v60 = vadd.f32 %v2722_v38, %v1601_v14  ;;  %v2881_v2 = vpop.f32.mrb[26].mxu1  ;;  %v2724_v18 = vpop.f32.mrb[27].mxu0  ;;  %v2896_v30 = vmax.f32 %v3455_v55, 0.0 }
 0x3a0   :  { %v3465_v20 = vadd.f32 %v2881_v2, %v1609_v29  ;;  %v3458_v3 = vadd.f32 %v2724_v18, %v1605_v28  ;;  %v2883_v39 = vpop.f32.mrb[27].mxu1  ;;  %v2898_v0 = vmax.f32 %v3463_v10, 0.0  ;;  %v2897_v5 = vmax.f32 %v3456_v16, 0.0 }
 0x3a1   :  { %v2900_v4 = vmax.f32 %v3457_v60, 0.0  ;;  %v3466_v53 = vadd.f32 %v2883_v39, %v1613_v47  ;;  %v2899_v43 = vmax.f32 %v3464_v40, 0.0 }
 0x3a2   :  { %v2902_v21 = vmax.f32 %v3465_v20, 0.0  ;;  %v2901_v44 = vmax.f32 %v3458_v3, 0.0 }
 0x3a3   :  { %v5169_v15 = vpack.c.bf16 %v2900_v4, %v2896_v30  ;;  %v2903_v23 = vmax.f32 %v3466_v53, 0.0 }
 0x3a4   :  { %v5171_v31 = vpack.c.bf16 %v2902_v21, %v2898_v0  ;;  %v5173_v13 = vpack.c.bf16 %v2901_v44, %v2897_v5  ;;  %v2728_v19 = vpop.f32.mrb[28].mxu0 }
 0x3a5   :  { %v5175_v22 = vpack.c.bf16 %v2903_v23, %v2899_v43  ;;  %v2887_v48 = vpop.f32.mrb[28].mxu1  ;;  %v2730_v24 = vpop.f32.mrb[29].mxu0  ;;  %v2923_v37 = vshll.u32 %v5169_v15, 16  ;;  %v3459_v45 = vadd.f32 %v2728_v19, %v1601_v14  ;;  %v2921_v49 = vshrl.u32 %v5169_v15, 16 }
 0x3a6   :  { %v2889_v25 = vpop.f32.mrb[29].mxu1  ;;  %v2732_v1 = vpop.f32.mrb[30].mxu0  ;;  %v2947_v7 = vshll.u32 %v5171_v31, 16  ;;  %v3467_v26 = vadd.f32 %v2887_v48, %v1609_v29  ;;  %v3460_v57 = vadd.f32 %v2730_v24, %v1605_v28  ;;  %v2935_v32 = vshll.u32 %v5173_v13, 16 }
 0x3a7   :  { %v2891_v52 = vpop.f32.mrb[30].mxu1  ;;  %v2734_v6 = vpop.f32.mrb[31].mxu0  ;;  %v3468_v34 = vadd.f32 %v2889_v25, %v1613_v47  ;;  %v3461_v9 = vadd.f32 %v2732_v1, %v1601_v14  ;;  %v2925_v58 = vrot.slane %v2923_v37, 1  ;;  %v2959_v46 = vshll.u32 %v5175_v22, 16 }
 0x3a8   :  { %v2893_v8 = vpop.f32.mrb[31].mxu1  ;;  %v3469_v54 = vadd.f32 %v2891_v52, %v1609_v29  ;;  %v2904_v33 = vmax.f32 %v3459_v45, 0.0  ;;  %v3462_v36 = vadd.f32 %v2734_v6, %v1605_v28  ;;  %v2949_v35 = vrot.slane %v2947_v7, 1 }
 0x3a9   :  { %v2908_v63 = vmax.f32 %v3461_v9, 0.0  ;;  %v3470_v11 = vadd.f32 %v2893_v8, %v1613_v47  ;;  %v2906_v56 = vmax.f32 %v3467_v26, 0.0  ;;  %v2905_v42 = vmax.f32 %v3460_v57, 0.0 }
 0x3aa   :  { %v2910_v62 = vmax.f32 %v3469_v54, 0.0  ;;  %v2907_v12 = vmax.f32 %v3468_v34, 0.0  ;;  %v2909_v61 = vmax.f32 %v3462_v36, 0.0  ;;  %v2945_v51 = vshrl.u32 %v5171_v31, 16 }
 0x3ab   :  { %v2916_v50 = vpack.c.bf16 %v2908_v63, %v2904_v33  ;;  %v2911_v14 = vmax.f32 %v3470_v11, 0.0  ;;  %v2937_v55 = vrot.slane %v2935_v32, 1  ;;  %v2961_v27 = vrot.slane %v2959_v46, 1 }
 0x3ac   :  { %v2918_v59 = vpack.c.bf16 %v2910_v62, %v2906_v56  ;;  %v2933_v10 = vshrl.u32 %v5173_v13, 16  ;;  %v2917_v16 = vpack.c.bf16 %v2909_v61, %v2905_v42  ;;  %v2926_v28 = vor.u32 %v2925_v58, %v2921_v49 }
 0x3ad   :  { %v2928_v29 = vshll.u32 %v2916_v50, 16  ;;  %v2919_v17 = vpack.c.bf16 %v2911_v14, %v2907_v12  ;;  %v2950_v47 = vor.u32 %v2949_v35, %v2945_v51  ;;  %v2957_v38 = vshrl.u32 %v5175_v22, 16 }
 0x3ae   :  { %v2952_v40 = vshll.u32 %v2918_v59, 16  ;;  %v2968_v2 = vshrl.u32 %v2916_v50, 16  ;;  %v2940_v18 = vshll.u32 %v2917_v16, 16  ;;  %v2974_v39 = vshrl.u32 %v2918_v59, 16 }
 0x3af   :  { %v2930_v60 = vrot.slane %v2928_v29, 1  ;;  %v2964_v20 = vshll.u32 %v2919_v17, 16  ;;  %v2938_v30 = vor.u32 %v2937_v55, %v2933_v10  ;;  %v2962_v4 = vor.u32 %v2961_v27, %v2957_v38 }
 0x3b0   :  { %v2954_v3 = vrot.slane %v2952_v40, 1  ;;  %v2942_v0 = vrot.slane %v2940_v18, 1  ;;  %v2971_v43 = vshrl.u32 %v2917_v16, 16  ;;  %v2977_v48 = vshrl.u32 %v2919_v17, 16 }
 0x3b1   :  { %v2970_v53 = vor.u32 %v2968_v2, %v2930_v60  ;;  %v2966_v5 = vrot.slane %v2964_v20, 1  ;;  %v2931_v21 = vsel %vm59_vm0, %v2926_v28, %v2930_v60  ;;  %v3009_v7 = vsel %vm1222_vm2, %v3008_v41, 0 }
 0x3b2   :  { %v2976_v44 = vor.u32 %v2974_v39, %v2954_v3  ;;  %v2988_v23 = vmax.bf16 %v2931_v21, %v5169_v15  ;;  %v2955_v19 = vsel %vm59_vm0, %v2950_v47, %v2954_v3  ;;  %v2943_v24 = vsel %vm59_vm0, %v2938_v30, %v2942_v0 }
 0x3b3   :  { %v2967_v37 = vsel %vm59_vm0, %v2962_v4, %v2966_v5  ;;  %v2990_v25 = vmax.bf16 %v2955_v19, %v5171_v31  ;;  %v2989_v1 = vmax.bf16 %v2943_v24, %v5173_v13  ;;  %v2973_v52 = vor.u32 %v2971_v43, %v2942_v0  ;;  %v3975_v13 = vld [vmem:[%s5215_s6] sm:$0x3f]  }
 0x3b4   :  { %v2991_v45 = vmax.bf16 %v2967_v37, %v5175_v22  ;;  %v2992_v6 = vmax.bf16 %v2970_v53, %v2916_v50  ;;  %v2979_v26 = vor.u32 %v2977_v48, %v2966_v5  ;;  %v2994_v57 = vmax.bf16 %v2976_v44, %v2918_v59 }
 0x3b5   :  { %3022 = vmatprep.subr.bf16.mxu0 %v2989_v1  ;;  %v2993_v15 = vmax.bf16 %v2973_v52, %v2917_v16 }
 0x3b6   :  { %3065 = vmatprep.subr.bf16.mxu1 %v2991_v45  ;;  %3023 = vmatpush1.bf16.msra.mxu0 %v2988_v23  ;;  %v2995_v8 = vmax.bf16 %v2979_v26, %v2919_v17  ;;  %v3011_v9 = vand.u32 %v3009_v7, %v2992_v6  ;;  %v3017_v31 = vand.u32 %v3009_v7, %v2994_v57 }
 0x3b7   :  { %3066 = vmatpush1.bf16.msra.mxu1 %v2990_v25  ;;  %v3014_v49 = vand.u32 %v3009_v7, %v2993_v15 }
 0x3b8   :  { %v3020_v34 = vand.u32 %v3009_v7, %v2995_v8 }
 0x3b9   :  { %3024 = vmatprep.subr.bf16.mxu0 %v3014_v49 }
 0x3ba   :  { %3067 = vmatprep.subr.bf16.mxu1 %v3020_v34  ;;  %3025 = vmatpush1.bf16.msra.mxu0 %v3011_v9 }
 0x3bb   :  { %3068 = vmatpush1.bf16.msra.mxu1 %v3017_v31 }
 0x3bd   :  { %3421 = vmatmul.mubr.msk.bf16.vlgmr.msra.gmra.mrb[32].mxu0 %vm3003_vm5, %v3975_v13 }
 0x3be   :  { %3422 = vmatmul.mubr.msk.bf16.vlgmr.msra.gmra.mrb[32].mxu1 %vm3003_vm5, %v3975_v13 }
 0x490   :  { %v3056_v22 = vpop.f32.mrb[32].mxu0 }
 0x491   :  { %v3099_v41 = vpop.f32.mrb[32].mxu1  ;;  %v3058_v58 = vpop.f32.mrb[33].mxu0 }
 0x492   :  { %v3108_v32 = vmax.f32 %v3056_v22, %v3099_v41  ;;  %v3101_v46 = vpop.f32.mrb[33].mxu1  ;;  %v3060_v54 = vpop.f32.mrb[34].mxu0 }
 0x493   :  { %v3109_v33 = vmax.f32 %v3058_v58, %v3101_v46  ;;  %v3103_v63 = vpop.f32.mrb[34].mxu1  ;;  %v3062_v36 = vpop.f32.mrb[35].mxu0 }
 0x494   :  { %3112 = vst [vmem:[%s5217_s7] sm:$0xff] %v3108_v32  ;;  %v3110_v11 = vmax.f32 %v3060_v54, %v3103_v63  ;;  %v3105_v35 = vpop.f32.mrb[35].mxu1 }
 0x495   :  { %3114 = vst.msk [vmem:[%s5217_s7 + $0x8] sm:$0xff] %vm3113_vm6, %v3109_v33  ;;  %v3111_v56 = vmax.f32 %v3062_v36, %v3105_v35 }
 0x496   :  { %3115 = vst [vmem:[%s5217_s7 + $0x10] sm:$0xf] %v3110_v11 }
 0x497   :  { %3117 = vst.msk [vmem:[%s5217_s7 + $0x18] sm:$0xf] %vm3116_vm7, %v3111_v56 }

</bundles_post_ra>
